<compile_context>
chip_gen: v7x
topology: tpu7x:2x2x1
jax: 0.10.0
libtpu: 0.0.40
codegen_flags: <defaults>
</compile_context>

<pallas_src>
import jax
import jax.numpy as jnp
from jax.experimental import pallas as pl
from jax.experimental.pallas import tpu as pltpu


def _round_up(v, m):
    return ((v + m - 1) // m) * m


# Effectively -inf for the maxpool padding.  It can never win the max because
# the window's center tap (dh=dw=0) is always inside the image (pad < kernel).
_NEG = -3.0e38


# ----------------------------------------------------------------------------
# Fused inception kernel factory (closes over static shapes)
# ----------------------------------------------------------------------------
def _make_inception_kernel(H, W, Cin, C1, C3r, C3, C5r, C5, Cp, K3, K5, Kp, d):
    HW = H * W
    Ctot = C1 + C3 + C5 + Cp
    p3 = d * (K3 // 2)          # 'same' pad for 3x3 branch
    p5 = d * (K5 // 2)          # 'same' pad for 5x5 branch
    pp = d                      # MaxPool2d(padding=dilation); taps unit-spaced

    off3 = p3 * W + p3          # max |flat shift| of a 3x3 tap
    off5 = p5 * W + p5
    offp = pp * W + pp
    # Left pad rounded up to a lane multiple so interior/strip writes are
    # lane-aligned (unaligned *reads* of the taps are cheap XLU rotates).
    L3 = _round_up(off3, 128)
    L5 = _round_up(off5, 128)
    Lp = _round_up(offp, 128)

    flat3_shape = (C3r, L3 + HW + off3)
    flat5_shape = (C5r, L5 + HW + off5)
    flatp_shape = (Cin, Lp + HW + offp)
    patch3_shape = (K3 * K3 * C3r, HW)
    patch5_shape = (K5 * K5 * C5r, HW)

    def kernel(widx_ref, x_ref, wred_ref, bred_ref, w3_ref, b3_ref,
               w5_ref, b5_ref, wp_ref, bp_ref, o_ref,
               flat3_ref, flat5_ref, flatp_ref, patch3_ref, patch5_ref):
        widx = widx_ref[...]                    # (1, HW) int32: w-coord per flat position
        x = x_ref[0]                            # (Cin, HW) bf16

        # Column-validity masks keyed by horizontal tap offset dw (trace-time memoized).
        mask_cache = {}

        def wmask(dw):
            if dw not in mask_cache:
                if dw < 0:
                    mask_cache[dw] = widx >= -dw
                elif dw > 0:
                    mask_cache[dw] = widx < W - dw
                else:
                    mask_cache[dw] = None
            return mask_cache[dw]

        # ---- merged 1x1 "reduce" convolutions: one (Cred,Cin)x(Cin,HW) MXU pass ----
        red = jnp.dot(wred_ref[...], x, preferred_element_type=jnp.float32)
        red = jnp.maximum(red + bred_ref[...], 0.0)          # (Cred, HW) f32
        out1 = red[0:C1]                                     # 1x1 branch output
        r3 = red[C1:C1 + C3r]                                # 3x3 branch input
        r5 = red[C1 + C3r:C1 + C3r + C5r]                    # 5x5 branch input

        # ---- KxK dilated conv as a single im2col matmul ----
        # Flat zero-padded scratch: only the thin pad strips are refilled; the
        # interior is overwritten every iteration.  Vertical out-of-range taps
        # land in the pad strips; horizontal wrap is killed by the w-mask.
        def conv_branch(r, flat_ref, patch_ref, L, off, K, p, Cr, w_ref, b_ref):
            flat_ref[:, 0:L] = jnp.zeros((Cr, L), jnp.float32)
            flat_ref[:, L + HW:L + HW + off] = jnp.zeros((Cr, off), jnp.float32)
            flat_ref[:, L:L + HW] = r
            t = 0
            for kh in range(K):
                for kw in range(K):
                    dh = kh * d - p
                    dw = kw * d - p
                    start = L + dh * W + dw
                    tap = flat_ref[:, start:start + HW]       # (Cr, HW)
                    m = wmask(dw)
                    if m is not None:
                        tap = jnp.where(m, tap, 0.0)
                    patch_ref[t * Cr:(t + 1) * Cr, :] = tap
                    t += 1
            patch = patch_ref[...].astype(jnp.bfloat16)       # (K*K*Cr, HW)
            out = jnp.dot(w_ref[...], patch, preferred_element_type=jnp.float32)
            return jnp.maximum(out + b_ref[...], 0.0)

        out3 = conv_branch(r3, flat3_ref, patch3_ref, L3, off3, K3, p3, C3r,
                           w3_ref, b3_ref)
        out5 = conv_branch(r5, flat5_ref, patch5_ref, L5, off5, K5, p5, C5r,
                           w5_ref, b5_ref)

        # ---- stride-1 maxpool (-inf padding) fused with the pool_proj 1x1 conv ----
        flatp_ref[:, 0:Lp] = jnp.full((Cin, Lp), _NEG, jnp.float32)
        flatp_ref[:, Lp + HW:Lp + HW + offp] = jnp.full((Cin, offp), _NEG, jnp.float32)
        flatp_ref[:, Lp:Lp + HW] = x.astype(jnp.float32)
        pooled = None
        for kh in range(Kp):
            for kw in range(Kp):
                dh = kh - pp
                dw = kw - pp
                start = Lp + dh * W + dw
                tap = flatp_ref[:, start:start + HW]
                m = wmask(dw)
                if m is not None:
                    tap = jnp.where(m, tap, _NEG)
                pooled = tap if pooled is None else jnp.maximum(pooled, tap)
        outp = jnp.dot(wp_ref[...], pooled.astype(jnp.bfloat16),
                       preferred_element_type=jnp.float32)
        outp = jnp.maximum(outp + bp_ref[...], 0.0)

        # ---- lane-dense (HW lanes) channel-row stores of one CHW block ----
        o_ref[0, 0:C1, :] = out1
        o_ref[0, C1:C1 + C3, :] = out3
        o_ref[0, C1 + C3:C1 + C3 + C5, :] = out5
        o_ref[0, C1 + C3 + C5:Ctot, :] = outp

    scratch = [pltpu.VMEM(flat3_shape, jnp.float32),
               pltpu.VMEM(flat5_shape, jnp.float32),
               pltpu.VMEM(flatp_shape, jnp.float32),
               pltpu.VMEM(patch3_shape, jnp.float32),
               pltpu.VMEM(patch5_shape, jnp.float32)]
    return kernel, scratch, Ctot


# ----------------------------------------------------------------------------
# Inception_base forward (single fused pallas_call, no wrapper transposes)
# ----------------------------------------------------------------------------
def inception_base_forward(x_nchw, params, pool_k, dilation=1):
    N, Cin, H, W = x_nchw.shape
    HW = H * W
    # Pool output spatial must match the conv branches for the channel concat
    # (same constraint the PyTorch module needs to not shape-error at cat()).
    assert pool_k == 2 * dilation + 1, "pool_k must equal 2*dilation+1"

    w1, b1 = params["w_1x1"], params["b_1x1"]                   # (C1, Cin)
    w3r, b3r = params["w_3x3_reduce"], params["b_3x3_reduce"]   # (C3r, Cin)
    w3, b3 = params["w_3x3"], params["b_3x3"]                   # (C3, C3r, K, K)
    w5r, b5r = params["w_5x5_reduce"], params["b_5x5_reduce"]
    w5, b5 = params["w_5x5"], params["b_5x5"]
    wp, bp = params["w_pool_proj"], params["b_pool_proj"]

    C1, C3r, C5r = w1.shape[0], w3r.shape[0], w5r.shape[0]
    C3, C5, Cp = w3.shape[0], w5.shape[0], wp.shape[0]
    K3, K5 = w3.shape[-1], w5.shape[-1]
    Cred = C1 + C3r + C5r

    cdt = jnp.bfloat16
    # NCHW -> (N, C, H*W): HW on the lane axis, no transpose needed.
    x_flat = x_nchw.reshape(N, Cin, HW).astype(cdt)

    # Merge the three 1x1 'reduce' convs into one matmul; im2col-flatten KxK weights
    # to (Cout, K*K*Cr) with row order (kh, kw, ci) matching the in-kernel patches.
    w_red = jnp.concatenate([w1, w3r, w5r], axis=0).astype(cdt)                 # (Cred, Cin)
    b_red = jnp.concatenate([b1, b3r, b5r], axis=0).reshape(Cred, 1).astype(jnp.float32)
    w3_mat = jnp.transpose(w3, (0, 2, 3, 1)).reshape(C3, K3 * K3 * C3r).astype(cdt)
    w5_mat = jnp.transpose(w5, (0, 2, 3, 1)).reshape(C5, K5 * K5 * C5r).astype(cdt)
    wp_m = wp.astype(cdt)
    b3_c = b3.reshape(C3, 1).astype(jnp.float32)
    b5_c = b5.reshape(C5, 1).astype(jnp.float32)
    bp_c = bp.reshape(Cp, 1).astype(jnp.float32)

    # w-coordinate of every flat HW position (used for horizontal tap masks).
    widx = (jnp.arange(HW, dtype=jnp.int32) % W).reshape(1, HW)

    kernel, scratch, Ctot = _make_inception_kernel(
        H, W, Cin, C1, C3r, C3, C5r, C5, Cp, K3, K5, pool_k, dilation)

    # TODO(synk): at real GoogLeNet sizes add an H-band grid axis ("arbitrary",
    # with p-row halos) so each v7x core gets >=2 steps and per-step VMEM stays
    # within the 64 MiB limit; set vmem_limit_bytes accordingly.
    out = pl.pallas_call(
        kernel,
        out_shape=jax.ShapeDtypeStruct((N, Ctot, HW), jnp.float32),
        grid_spec=pltpu.PrefetchScalarGridSpec(
            num_scalar_prefetch=0,
            grid=(N,),
            in_specs=[
                pl.BlockSpec((1, HW), lambda n: (0, 0)),               # widx
                pl.BlockSpec((1, Cin, HW), lambda n: (n, 0, 0)),       # x (per image)
                pl.BlockSpec((Cred, Cin), lambda n: (0, 0)),           # merged reduce W
                pl.BlockSpec((Cred, 1), lambda n: (0, 0)),             # merged reduce b
                pl.BlockSpec((C3, K3 * K3 * C3r), lambda n: (0, 0)),   # w_3x3 (im2col)
                pl.BlockSpec((C3, 1), lambda n: (0, 0)),
                pl.BlockSpec((C5, K5 * K5 * C5r), lambda n: (0, 0)),   # w_5x5 (im2col)
                pl.BlockSpec((C5, 1), lambda n: (0, 0)),
                pl.BlockSpec((Cp, Cin), lambda n: (0, 0)),             # w_pool_proj
                pl.BlockSpec((Cp, 1), lambda n: (0, 0)),
            ],
            out_specs=pl.BlockSpec((1, Ctot, HW), lambda n: (n, 0, 0)),
            scratch_shapes=scratch,
        ),
        compiler_params=pltpu.CompilerParams(
            dimension_semantics=("parallel",)),
    )(widx, x_flat, w_red, b_red, w3_mat, b3_c, w5_mat, b5_c, wp_m, bp_c)

    return out.reshape(N, Ctot, H, W)          # already NCHW (depth_dim=1)


# ----------------------------------------------------------------------------
# Pure-JAX reference for validation (f32, NCHW throughout)
# ----------------------------------------------------------------------------
def _conv_ref(x, w_oihw, b, dilation=1):
    K = w_oihw.shape[-1]
    p = dilation * (K // 2)
    y = jax.lax.conv_general_dilated(
        x, w_oihw, window_strides=(1, 1), padding=((p, p), (p, p)),
        rhs_dilation=(dilation, dilation),
        dimension_numbers=("NCHW", "OIHW", "NCHW"))
    return jax.nn.relu(y + b[None, :, None, None])


def _forward_ref(x, params, pool_k, dilation=1):
    x = x.astype(jnp.float32)
    to4 = lambda w: w[:, :, None, None]
    o1 = _conv_ref(x, to4(params["w_1x1"]), params["b_1x1"])
    o2 = _conv_ref(x, to4(params["w_3x3_reduce"]), params["b_3x3_reduce"])
    o2 = _conv_ref(o2, params["w_3x3"], params["b_3x3"], dilation)
    o3 = _conv_ref(x, to4(params["w_5x5_reduce"]), params["b_5x5_reduce"])
    o3 = _conv_ref(o3, params["w_5x5"], params["b_5x5"], dilation)
    pad = dilation
    o4 = jax.lax.reduce_window(
        x, -jnp.inf, jax.lax.max, (1, 1, pool_k, pool_k), (1, 1, 1, 1),
        padding=((0, 0), (0, 0), (pad, pad), (pad, pad)))
    o4 = _conv_ref(o4, to4(params["w_pool_proj"]), params["b_pool_proj"])
    return jnp.concatenate([o1, o2, o3, o4], axis=1)


# ----------------------------------------------------------------------------
# main
# ----------------------------------------------------------------------------
if __name__ == "__main__":
    # Module hyper-params (synthetic, deterministic):
    #   depth_dim=1, input_size=4, config=[[8],[4,8],[2,4],[3,8]], dilation=1
    N, Cin, H, W = 2, 4, 16, 16
    config = [[8], [4, 8], [2, 4], [3, 8]]
    dilation = 1
    pool_k = config[3][0]
    C1 = config[0][0]
    C3r, C3 = config[1]
    C5r, C5 = config[2]
    Cp = config[3][1]

    key = jax.random.PRNGKey(0)
    ks = jax.random.split(key, 16)

    def winit(k, shape, scale=0.1):
        return scale * jax.random.normal(k, shape, dtype=jnp.float32)

    params = {
        "w_1x1": winit(ks[0], (C1, Cin)),
        "b_1x1": winit(ks[1], (C1,)),
        "w_3x3_reduce": winit(ks[2], (C3r, Cin)),
        "b_3x3_reduce": winit(ks[3], (C3r,)),
        "w_3x3": winit(ks[4], (C3, C3r, 3, 3)),
        "b_3x3": winit(ks[5], (C3,)),
        "w_5x5_reduce": winit(ks[6], (C5r, Cin)),
        "b_5x5_reduce": winit(ks[7], (C5r,)),
        "w_5x5": winit(ks[8], (C5, C5r, 5, 5)),
        "b_5x5": winit(ks[9], (C5,)),
        "w_pool_proj": winit(ks[10], (Cp, Cin)),
        "b_pool_proj": winit(ks[11], (Cp,)),
    }

    x = jax.random.normal(ks[12], (N, Cin, H, W), dtype=jnp.float32)

    out = jax.block_until_ready(inception_base_forward(x, params, pool_k, dilation))

    expected_c = C1 + C3 + C5 + Cp
    assert out.shape == (N, expected_c, H, W), out.shape

    ref = jax.block_until_ready(_forward_ref(x, params, pool_k, dilation))
    max_err = float(jnp.max(jnp.abs(out - ref)))
    # bf16 MXU operands (f32 accumulation) -> relaxed tolerance vs the f32 reference.
    assert jnp.allclose(out, ref, rtol=2e-2, atol=2e-2), max_err

    print("KERNEL_OK")
</pallas_src>

<mosaic_0001>
module attributes {stable_mosaic.version = 11 : i64} {
  func.func @kernel(%arg0: i32, %arg1: memref<1x256xi32, #tpu.memory_space<vmem>>, %arg2: memref<1x4x256xbf16, #tpu.memory_space<vmem>>, %arg3: memref<14x4xbf16, #tpu.memory_space<vmem>>, %arg4: memref<14x1xf32, #tpu.memory_space<vmem>>, %arg5: memref<8x36xbf16, #tpu.memory_space<vmem>>, %arg6: memref<8x1xf32, #tpu.memory_space<vmem>>, %arg7: memref<4x50xbf16, #tpu.memory_space<vmem>>, %arg8: memref<4x1xf32, #tpu.memory_space<vmem>>, %arg9: memref<8x4xbf16, #tpu.memory_space<vmem>>, %arg10: memref<8x1xf32, #tpu.memory_space<vmem>>, %arg11: memref<1x28x256xf32, #tpu.memory_space<vmem>>, %arg12: memref<4x401xf32, #tpu.memory_space<vmem>>, %arg13: memref<2x418xf32, #tpu.memory_space<vmem>>, %arg14: memref<4x401xf32, #tpu.memory_space<vmem>>, %arg15: memref<36x256xf32, #tpu.memory_space<vmem>>, %arg16: memref<50x256xf32, #tpu.memory_space<vmem>>) attributes {dimension_semantics = [#tpu.dimension_semantics<parallel>], iteration_bounds = array<i64: 2>, scalar_prefetch = 0 : i64, scratch_operands = 5 : i64, tpu.core_type = #tpu.core_type<tc>, window_params = [{pipeline_mode = #tpu.pipeline_mode<synchronous>, transform_indices = @transform_0, window_bounds = array<i64: 1, 256>}, {transform_indices = @transform_1, window_bounds = array<i64: 1, 4, 256>}, {pipeline_mode = #tpu.pipeline_mode<synchronous>, transform_indices = @transform_2, window_bounds = array<i64: 14, 4>}, {pipeline_mode = #tpu.pipeline_mode<synchronous>, transform_indices = @transform_3, window_bounds = array<i64: 14, 1>}, {pipeline_mode = #tpu.pipeline_mode<synchronous>, transform_indices = @transform_4, window_bounds = array<i64: 8, 36>}, {pipeline_mode = #tpu.pipeline_mode<synchronous>, transform_indices = @transform_5, window_bounds = array<i64: 8, 1>}, {pipeline_mode = #tpu.pipeline_mode<synchronous>, transform_indices = @transform_6, window_bounds = array<i64: 4, 50>}, {pipeline_mode = #tpu.pipeline_mode<synchronous>, transform_indices = @transform_7, window_bounds = array<i64: 4, 1>}, {pipeline_mode = #tpu.pipeline_mode<synchronous>, transform_indices = @transform_8, window_bounds = array<i64: 8, 4>}, {pipeline_mode = #tpu.pipeline_mode<synchronous>, transform_indices = @transform_9, window_bounds = array<i64: 8, 1>}, {transform_indices = @transform_10, window_bounds = array<i64: 1, 28, 256>}]} {
    %c0 = arith.constant 0 : index
    %c0_0 = arith.constant 0 : index
    %0 = vector.load %arg1[%c0, %c0_0] : memref<1x256xi32, #tpu.memory_space<vmem>>, vector<1x256xi32>
    %c0_1 = arith.constant 0 : index
    %c0_2 = arith.constant 0 : index
    %c0_3 = arith.constant 0 : index
    %1 = vector.load %arg2[%c0_1, %c0_2, %c0_3] : memref<1x4x256xbf16, #tpu.memory_space<vmem>>, vector<1x4x256xbf16>
    %2 = vector.shape_cast %1 : vector<1x4x256xbf16> to vector<4x256xbf16>
    %c0_4 = arith.constant 0 : index
    %c0_5 = arith.constant 0 : index
    %3 = vector.load %arg3[%c0_4, %c0_5] : memref<14x4xbf16, #tpu.memory_space<vmem>>, vector<14x4xbf16>
    %cst = arith.constant dense<0.000000e+00> : vector<14x256xf32>
    %4 = tpu.matmul %3, %2, %cst {dimension_numbers = #tpu.dot_dimension_numbers<[1], [0], [0], [1], [0, 0, 1, 1], [], []>} : vector<14x4xbf16>, vector<4x256xbf16>, vector<14x256xf32> -> vector<14x256xf32>
    %c0_6 = arith.constant 0 : index
    %c0_7 = arith.constant 0 : index
    %5 = vector.load %arg4[%c0_6, %c0_7] : memref<14x1xf32, #tpu.memory_space<vmem>>, vector<14x1xf32>
    %6 = vector.broadcast %5 : vector<14x1xf32> to vector<14x256xf32>
    %7 = arith.addf %4, %6 : vector<14x256xf32>
    %cst_8 = arith.constant 0.000000e+00 : f32
    %8 = vector.broadcast %cst_8 : f32 to vector<14x256xf32>
    %9 = arith.maximumf %7, %8 : vector<14x256xf32>
    %10 = vector.extract_strided_slice %9 {offsets = [0, 0], sizes = [8, 256], strides = [1, 1]} : vector<14x256xf32> to vector<8x256xf32>
    %11 = vector.extract_strided_slice %9 {offsets = [8, 0], sizes = [4, 256], strides = [1, 1]} : vector<14x256xf32> to vector<4x256xf32>
    %12 = vector.extract_strided_slice %9 {offsets = [12, 0], sizes = [2, 256], strides = [1, 1]} : vector<14x256xf32> to vector<2x256xf32>
    %cst_9 = arith.constant 0.000000e+00 : f32
    %13 = vector.broadcast %cst_9 : f32 to vector<4x128xf32>
    %c0_10 = arith.constant 0 : index
    %c0_11 = arith.constant 0 : index
    %14 = vector.load %arg12[%c0_10, %c0_11] : memref<4x401xf32, #tpu.memory_space<vmem>>, vector<4x128xf32>
    tpu.vector_store %arg12[%c0_10, %c0_11], %13 {strides = array<i32>} : memref<4x401xf32, #tpu.memory_space<vmem>>, vector<4x128xf32>,
    %cst_12 = arith.constant 0.000000e+00 : f32
    %15 = vector.broadcast %cst_12 : f32 to vector<4x17xf32>
    %c0_13 = arith.constant 0 : index
    %c384 = arith.constant 384 : index
    %16 = vector.load %arg12[%c0_13, %c384] : memref<4x401xf32, #tpu.memory_space<vmem>>, vector<4x17xf32>
    tpu.vector_store %arg12[%c0_13, %c384], %15 {strides = array<i32>} : memref<4x401xf32, #tpu.memory_space<vmem>>, vector<4x17xf32>,
    %c0_14 = arith.constant 0 : index
    %c128 = arith.constant 128 : index
    %17 = vector.load %arg12[%c0_14, %c128] : memref<4x401xf32, #tpu.memory_space<vmem>>, vector<4x256xf32>
    tpu.vector_store %arg12[%c0_14, %c128], %11 {strides = array<i32>} : memref<4x401xf32, #tpu.memory_space<vmem>>, vector<4x256xf32>,
    %c0_15 = arith.constant 0 : index
    %c111 = arith.constant 111 : index
    %18 = vector.load %arg12[%c0_15, %c111] : memref<4x401xf32, #tpu.memory_space<vmem>>, vector<4x256xf32>
    %c1_i32 = arith.constant 1 : i32
    %19 = vector.broadcast %c1_i32 : i32 to vector<1x256xi32>
    %20 = arith.cmpi sge, %0, %19 : vector<1x256xi32>
    %cst_16 = arith.constant 0.000000e+00 : f32
    %21 = vector.shape_cast %20 : vector<1x256xi1> to vector<1x256xi1>
    %22 = vector.broadcast %21 : vector<1x256xi1> to vector<4x256xi1>
    %23 = vector.broadcast %cst_16 : f32 to vector<4x256xf32>
    %24 = arith.select %22, %18, %23 : vector<4x256xi1>, vector<4x256xf32>
    %c0_17 = arith.constant 0 : index
    %c0_18 = arith.constant 0 : index
    %25 = vector.load %arg15[%c0_17, %c0_18] : memref<36x256xf32, #tpu.memory_space<vmem>>, vector<4x256xf32>
    tpu.vector_store %arg15[%c0_17, %c0_18], %24 {strides = array<i32>} : memref<36x256xf32, #tpu.memory_space<vmem>>, vector<4x256xf32>,
    %c0_19 = arith.constant 0 : index
    %c112 = arith.constant 112 : index
    %26 = vector.load %arg12[%c0_19, %c112] : memref<4x401xf32, #tpu.memory_space<vmem>>, vector<4x256xf32>
    %c4 = arith.constant 4 : index
    %c0_20 = arith.constant 0 : index
    %27 = vector.load %arg15[%c4, %c0_20] : memref<36x256xf32, #tpu.memory_space<vmem>>, vector<4x256xf32>
    tpu.vector_store %arg15[%c4, %c0_20], %26 {strides = array<i32>} : memref<36x256xf32, #tpu.memory_space<vmem>>, vector<4x256xf32>,
    %c0_21 = arith.constant 0 : index
    %c113 = arith.constant 113 : index
    %28 = vector.load %arg12[%c0_21, %c113] : memref<4x401xf32, #tpu.memory_space<vmem>>, vector<4x256xf32>
    %c15_i32 = arith.constant 15 : i32
    %29 = vector.broadcast %c15_i32 : i32 to vector<1x256xi32>
    %30 = arith.cmpi slt, %0, %29 : vector<1x256xi32>
    %cst_22 = arith.constant 0.000000e+00 : f32
    %31 = vector.shape_cast %30 : vector<1x256xi1> to vector<1x256xi1>
    %32 = vector.broadcast %31 : vector<1x256xi1> to vector<4x256xi1>
    %33 = vector.broadcast %cst_22 : f32 to vector<4x256xf32>
    %34 = arith.select %32, %28, %33 : vector<4x256xi1>, vector<4x256xf32>
    %c8 = arith.constant 8 : index
    %c0_23 = arith.constant 0 : index
    %35 = vector.load %arg15[%c8, %c0_23] : memref<36x256xf32, #tpu.memory_space<vmem>>, vector<4x256xf32>
    tpu.vector_store %arg15[%c8, %c0_23], %34 {strides = array<i32>} : memref<36x256xf32, #tpu.memory_space<vmem>>, vector<4x256xf32>,
    %c0_24 = arith.constant 0 : index
    %c127 = arith.constant 127 : index
    %36 = vector.load %arg12[%c0_24, %c127] : memref<4x401xf32, #tpu.memory_space<vmem>>, vector<4x256xf32>
    %cst_25 = arith.constant 0.000000e+00 : f32
    %37 = vector.shape_cast %20 : vector<1x256xi1> to vector<1x256xi1>
    %38 = vector.broadcast %37 : vector<1x256xi1> to vector<4x256xi1>
    %39 = vector.broadcast %cst_25 : f32 to vector<4x256xf32>
    %40 = arith.select %38, %36, %39 : vector<4x256xi1>, vector<4x256xf32>
    %c12 = arith.constant 12 : index
    %c0_26 = arith.constant 0 : index
    %41 = vector.load %arg15[%c12, %c0_26] : memref<36x256xf32, #tpu.memory_space<vmem>>, vector<4x256xf32>
    tpu.vector_store %arg15[%c12, %c0_26], %40 {strides = array<i32>} : memref<36x256xf32, #tpu.memory_space<vmem>>, vector<4x256xf32>,
    %c0_27 = arith.constant 0 : index
    %c128_28 = arith.constant 128 : index
    %42 = vector.load %arg12[%c0_27, %c128_28] : memref<4x401xf32, #tpu.memory_space<vmem>>, vector<4x256xf32>
    %c16 = arith.constant 16 : index
    %c0_29 = arith.constant 0 : index
    %43 = vector.load %arg15[%c16, %c0_29] : memref<36x256xf32, #tpu.memory_space<vmem>>, vector<4x256xf32>
    tpu.vector_store %arg15[%c16, %c0_29], %42 {strides = array<i32>} : memref<36x256xf32, #tpu.memory_space<vmem>>, vector<4x256xf32>,
    %c0_30 = arith.constant 0 : index
    %c129 = arith.constant 129 : index
    %44 = vector.load %arg12[%c0_30, %c129] : memref<4x401xf32, #tpu.memory_space<vmem>>, vector<4x256xf32>
    %cst_31 = arith.constant 0.000000e+00 : f32
    %45 = vector.shape_cast %30 : vector<1x256xi1> to vector<1x256xi1>
    %46 = vector.broadcast %45 : vector<1x256xi1> to vector<4x256xi1>
    %47 = vector.broadcast %cst_31 : f32 to vector<4x256xf32>
    %48 = arith.select %46, %44, %47 : vector<4x256xi1>, vector<4x256xf32>
    %c20 = arith.constant 20 : index
    %c0_32 = arith.constant 0 : index
    %49 = vector.load %arg15[%c20, %c0_32] : memref<36x256xf32, #tpu.memory_space<vmem>>, vector<4x256xf32>
    tpu.vector_store %arg15[%c20, %c0_32], %48 {strides = array<i32>} : memref<36x256xf32, #tpu.memory_space<vmem>>, vector<4x256xf32>,
    %c0_33 = arith.constant 0 : index
    %c143 = arith.constant 143 : index
    %50 = vector.load %arg12[%c0_33, %c143] : memref<4x401xf32, #tpu.memory_space<vmem>>, vector<4x256xf32>
    %cst_34 = arith.constant 0.000000e+00 : f32
    %51 = vector.shape_cast %20 : vector<1x256xi1> to vector<1x256xi1>
    %52 = vector.broadcast %51 : vector<1x256xi1> to vector<4x256xi1>
    %53 = vector.broadcast %cst_34 : f32 to vector<4x256xf32>
    %54 = arith.select %52, %50, %53 : vector<4x256xi1>, vector<4x256xf32>
    %c24 = arith.constant 24 : index
    %c0_35 = arith.constant 0 : index
    %55 = vector.load %arg15[%c24, %c0_35] : memref<36x256xf32, #tpu.memory_space<vmem>>, vector<4x256xf32>
    tpu.vector_store %arg15[%c24, %c0_35], %54 {strides = array<i32>} : memref<36x256xf32, #tpu.memory_space<vmem>>, vector<4x256xf32>,
    %c0_36 = arith.constant 0 : index
    %c144 = arith.constant 144 : index
    %56 = vector.load %arg12[%c0_36, %c144] : memref<4x401xf32, #tpu.memory_space<vmem>>, vector<4x256xf32>
    %c28 = arith.constant 28 : index
    %c0_37 = arith.constant 0 : index
    %57 = vector.load %arg15[%c28, %c0_37] : memref<36x256xf32, #tpu.memory_space<vmem>>, vector<4x256xf32>
    tpu.vector_store %arg15[%c28, %c0_37], %56 {strides = array<i32>} : memref<36x256xf32, #tpu.memory_space<vmem>>, vector<4x256xf32>,
    %c0_38 = arith.constant 0 : index
    %c145 = arith.constant 145 : index
    %58 = vector.load %arg12[%c0_38, %c145] : memref<4x401xf32, #tpu.memory_space<vmem>>, vector<4x256xf32>
    %cst_39 = arith.constant 0.000000e+00 : f32
    %59 = vector.shape_cast %30 : vector<1x256xi1> to vector<1x256xi1>
    %60 = vector.broadcast %59 : vector<1x256xi1> to vector<4x256xi1>
    %61 = vector.broadcast %cst_39 : f32 to vector<4x256xf32>
    %62 = arith.select %60, %58, %61 : vector<4x256xi1>, vector<4x256xf32>
    %c32 = arith.constant 32 : index
    %c0_40 = arith.constant 0 : index
    %63 = vector.load %arg15[%c32, %c0_40] : memref<36x256xf32, #tpu.memory_space<vmem>>, vector<4x256xf32>
    tpu.vector_store %arg15[%c32, %c0_40], %62 {strides = array<i32>} : memref<36x256xf32, #tpu.memory_space<vmem>>, vector<4x256xf32>,
    %c0_41 = arith.constant 0 : index
    %c0_42 = arith.constant 0 : index
    %64 = vector.load %arg15[%c0_41, %c0_42] : memref<36x256xf32, #tpu.memory_space<vmem>>, vector<36x256xf32>
    %65 = arith.truncf %64 : vector<36x256xf32> to vector<36x256xbf16>
    %c0_43 = arith.constant 0 : index
    %c0_44 = arith.constant 0 : index
    %66 = vector.load %arg5[%c0_43, %c0_44] : memref<8x36xbf16, #tpu.memory_space<vmem>>, vector<8x36xbf16>
    %cst_45 = arith.constant dense<0.000000e+00> : vector<8x256xf32>
    %67 = tpu.matmul %66, %65, %cst_45 {dimension_numbers = #tpu.dot_dimension_numbers<[1], [0], [0], [1], [0, 0, 1, 1], [], []>} : vector<8x36xbf16>, vector<36x256xbf16>, vector<8x256xf32> -> vector<8x256xf32>
    %c0_46 = arith.constant 0 : index
    %c0_47 = arith.constant 0 : index
    %68 = vector.load %arg6[%c0_46, %c0_47] : memref<8x1xf32, #tpu.memory_space<vmem>>, vector<8x1xf32>
    %69 = vector.broadcast %68 : vector<8x1xf32> to vector<8x256xf32>
    %70 = arith.addf %67, %69 : vector<8x256xf32>
    %cst_48 = arith.constant 0.000000e+00 : f32
    %71 = vector.broadcast %cst_48 : f32 to vector<8x256xf32>
    %72 = arith.maximumf %70, %71 : vector<8x256xf32>
    %cst_49 = arith.constant 0.000000e+00 : f32
    %73 = vector.broadcast %cst_49 : f32 to vector<2x128xf32>
    %c0_50 = arith.constant 0 : index
    %c0_51 = arith.constant 0 : index
    %74 = vector.load %arg13[%c0_50, %c0_51] : memref<2x418xf32, #tpu.memory_space<vmem>>, vector<2x128xf32>
    tpu.vector_store %arg13[%c0_50, %c0_51], %73 {strides = array<i32>} : memref<2x418xf32, #tpu.memory_space<vmem>>, vector<2x128xf32>,
    %cst_52 = arith.constant 0.000000e+00 : f32
    %75 = vector.broadcast %cst_52 : f32 to vector<2x34xf32>
    %c0_53 = arith.constant 0 : index
    %c384_54 = arith.constant 384 : index
    %76 = vector.load %arg13[%c0_53, %c384_54] : memref<2x418xf32, #tpu.memory_space<vmem>>, vector<2x34xf32>
    tpu.vector_store %arg13[%c0_53, %c384_54], %75 {strides = array<i32>} : memref<2x418xf32, #tpu.memory_space<vmem>>, vector<2x34xf32>,
    %c0_55 = arith.constant 0 : index
    %c128_56 = arith.constant 128 : index
    %77 = vector.load %arg13[%c0_55, %c128_56] : memref<2x418xf32, #tpu.memory_space<vmem>>, vector<2x256xf32>
    tpu.vector_store %arg13[%c0_55, %c128_56], %12 {strides = array<i32>} : memref<2x418xf32, #tpu.memory_space<vmem>>, vector<2x256xf32>,
    %c0_57 = arith.constant 0 : index
    %c94 = arith.constant 94 : index
    %78 = vector.load %arg13[%c0_57, %c94] : memref<2x418xf32, #tpu.memory_space<vmem>>, vector<2x256xf32>
    %c2_i32 = arith.constant 2 : i32
    %79 = vector.broadcast %c2_i32 : i32 to vector<1x256xi32>
    %80 = arith.cmpi sge, %0, %79 : vector<1x256xi32>
    %cst_58 = arith.constant 0.000000e+00 : f32
    %81 = vector.shape_cast %80 : vector<1x256xi1> to vector<1x256xi1>
    %82 = vector.broadcast %81 : vector<1x256xi1> to vector<2x256xi1>
    %83 = vector.broadcast %cst_58 : f32 to vector<2x256xf32>
    %84 = arith.select %82, %78, %83 : vector<2x256xi1>, vector<2x256xf32>
    %c0_59 = arith.constant 0 : index
    %c0_60 = arith.constant 0 : index
    %85 = vector.load %arg16[%c0_59, %c0_60] : memref<50x256xf32, #tpu.memory_space<vmem>>, vector<2x256xf32>
    tpu.vector_store %arg16[%c0_59, %c0_60], %84 {strides = array<i32>} : memref<50x256xf32, #tpu.memory_space<vmem>>, vector<2x256xf32>,
    %c0_61 = arith.constant 0 : index
    %c95 = arith.constant 95 : index
    %86 = vector.load %arg13[%c0_61, %c95] : memref<2x418xf32, #tpu.memory_space<vmem>>, vector<2x256xf32>
    %cst_62 = arith.constant 0.000000e+00 : f32
    %87 = vector.shape_cast %20 : vector<1x256xi1> to vector<1x256xi1>
    %88 = vector.broadcast %87 : vector<1x256xi1> to vector<2x256xi1>
    %89 = vector.broadcast %cst_62 : f32 to vector<2x256xf32>
    %90 = arith.select %88, %86, %89 : vector<2x256xi1>, vector<2x256xf32>
    %c2 = arith.constant 2 : index
    %c0_63 = arith.constant 0 : index
    %91 = vector.load %arg16[%c2, %c0_63] : memref<50x256xf32, #tpu.memory_space<vmem>>, vector<2x256xf32>
    tpu.vector_store %arg16[%c2, %c0_63], %90 {strides = array<i32>} : memref<50x256xf32, #tpu.memory_space<vmem>>, vector<2x256xf32>,
    %c0_64 = arith.constant 0 : index
    %c96 = arith.constant 96 : index
    %92 = vector.load %arg13[%c0_64, %c96] : memref<2x418xf32, #tpu.memory_space<vmem>>, vector<2x256xf32>
    %c4_65 = arith.constant 4 : index
    %c0_66 = arith.constant 0 : index
    %93 = vector.load %arg16[%c4_65, %c0_66] : memref<50x256xf32, #tpu.memory_space<vmem>>, vector<2x256xf32>
    tpu.vector_store %arg16[%c4_65, %c0_66], %92 {strides = array<i32>} : memref<50x256xf32, #tpu.memory_space<vmem>>, vector<2x256xf32>,
    %c0_67 = arith.constant 0 : index
    %c97 = arith.constant 97 : index
    %94 = vector.load %arg13[%c0_67, %c97] : memref<2x418xf32, #tpu.memory_space<vmem>>, vector<2x256xf32>
    %cst_68 = arith.constant 0.000000e+00 : f32
    %95 = vector.shape_cast %30 : vector<1x256xi1> to vector<1x256xi1>
    %96 = vector.broadcast %95 : vector<1x256xi1> to vector<2x256xi1>
    %97 = vector.broadcast %cst_68 : f32 to vector<2x256xf32>
    %98 = arith.select %96, %94, %97 : vector<2x256xi1>, vector<2x256xf32>
    %c6 = arith.constant 6 : index
    %c0_69 = arith.constant 0 : index
    %99 = vector.load %arg16[%c6, %c0_69] : memref<50x256xf32, #tpu.memory_space<vmem>>, vector<2x256xf32>
    tpu.vector_store %arg16[%c6, %c0_69], %98 {strides = array<i32>} : memref<50x256xf32, #tpu.memory_space<vmem>>, vector<2x256xf32>,
    %c0_70 = arith.constant 0 : index
    %c98 = arith.constant 98 : index
    %100 = vector.load %arg13[%c0_70, %c98] : memref<2x418xf32, #tpu.memory_space<vmem>>, vector<2x256xf32>
    %c14_i32 = arith.constant 14 : i32
    %101 = vector.broadcast %c14_i32 : i32 to vector<1x256xi32>
    %102 = arith.cmpi slt, %0, %101 : vector<1x256xi32>
    %cst_71 = arith.constant 0.000000e+00 : f32
    %103 = vector.shape_cast %102 : vector<1x256xi1> to vector<1x256xi1>
    %104 = vector.broadcast %103 : vector<1x256xi1> to vector<2x256xi1>
    %105 = vector.broadcast %cst_71 : f32 to vector<2x256xf32>
    %106 = arith.select %104, %100, %105 : vector<2x256xi1>, vector<2x256xf32>
    %c8_72 = arith.constant 8 : index
    %c0_73 = arith.constant 0 : index
    %107 = vector.load %arg16[%c8_72, %c0_73] : memref<50x256xf32, #tpu.memory_space<vmem>>, vector<2x256xf32>
    tpu.vector_store %arg16[%c8_72, %c0_73], %106 {strides = array<i32>} : memref<50x256xf32, #tpu.memory_space<vmem>>, vector<2x256xf32>,
    %c0_74 = arith.constant 0 : index
    %c110 = arith.constant 110 : index
    %108 = vector.load %arg13[%c0_74, %c110] : memref<2x418xf32, #tpu.memory_space<vmem>>, vector<2x256xf32>
    %cst_75 = arith.constant 0.000000e+00 : f32
    %109 = vector.shape_cast %80 : vector<1x256xi1> to vector<1x256xi1>
    %110 = vector.broadcast %109 : vector<1x256xi1> to vector<2x256xi1>
    %111 = vector.broadcast %cst_75 : f32 to vector<2x256xf32>
    %112 = arith.select %110, %108, %111 : vector<2x256xi1>, vector<2x256xf32>
    %c10 = arith.constant 10 : index
    %c0_76 = arith.constant 0 : index
    %113 = vector.load %arg16[%c10, %c0_76] : memref<50x256xf32, #tpu.memory_space<vmem>>, vector<2x256xf32>
    tpu.vector_store %arg16[%c10, %c0_76], %112 {strides = array<i32>} : memref<50x256xf32, #tpu.memory_space<vmem>>, vector<2x256xf32>,
    %c0_77 = arith.constant 0 : index
    %c111_78 = arith.constant 111 : index
    %114 = vector.load %arg13[%c0_77, %c111_78] : memref<2x418xf32, #tpu.memory_space<vmem>>, vector<2x256xf32>
    %cst_79 = arith.constant 0.000000e+00 : f32
    %115 = vector.shape_cast %20 : vector<1x256xi1> to vector<1x256xi1>
    %116 = vector.broadcast %115 : vector<1x256xi1> to vector<2x256xi1>
    %117 = vector.broadcast %cst_79 : f32 to vector<2x256xf32>
    %118 = arith.select %116, %114, %117 : vector<2x256xi1>, vector<2x256xf32>
    %c12_80 = arith.constant 12 : index
    %c0_81 = arith.constant 0 : index
    %119 = vector.load %arg16[%c12_80, %c0_81] : memref<50x256xf32, #tpu.memory_space<vmem>>, vector<2x256xf32>
    tpu.vector_store %arg16[%c12_80, %c0_81], %118 {strides = array<i32>} : memref<50x256xf32, #tpu.memory_space<vmem>>, vector<2x256xf32>,
    %c0_82 = arith.constant 0 : index
    %c112_83 = arith.constant 112 : index
    %120 = vector.load %arg13[%c0_82, %c112_83] : memref<2x418xf32, #tpu.memory_space<vmem>>, vector<2x256xf32>
    %c14 = arith.constant 14 : index
    %c0_84 = arith.constant 0 : index
    %121 = vector.load %arg16[%c14, %c0_84] : memref<50x256xf32, #tpu.memory_space<vmem>>, vector<2x256xf32>
    tpu.vector_store %arg16[%c14, %c0_84], %120 {strides = array<i32>} : memref<50x256xf32, #tpu.memory_space<vmem>>, vector<2x256xf32>,
    %c0_85 = arith.constant 0 : index
    %c113_86 = arith.constant 113 : index
    %122 = vector.load %arg13[%c0_85, %c113_86] : memref<2x418xf32, #tpu.memory_space<vmem>>, vector<2x256xf32>
    %cst_87 = arith.constant 0.000000e+00 : f32
    %123 = vector.shape_cast %30 : vector<1x256xi1> to vector<1x256xi1>
    %124 = vector.broadcast %123 : vector<1x256xi1> to vector<2x256xi1>
    %125 = vector.broadcast %cst_87 : f32 to vector<2x256xf32>
    %126 = arith.select %124, %122, %125 : vector<2x256xi1>, vector<2x256xf32>
    %c16_88 = arith.constant 16 : index
    %c0_89 = arith.constant 0 : index
    %127 = vector.load %arg16[%c16_88, %c0_89] : memref<50x256xf32, #tpu.memory_space<vmem>>, vector<2x256xf32>
    tpu.vector_store %arg16[%c16_88, %c0_89], %126 {strides = array<i32>} : memref<50x256xf32, #tpu.memory_space<vmem>>, vector<2x256xf32>,
    %c0_90 = arith.constant 0 : index
    %c114 = arith.constant 114 : index
    %128 = vector.load %arg13[%c0_90, %c114] : memref<2x418xf32, #tpu.memory_space<vmem>>, vector<2x256xf32>
    %cst_91 = arith.constant 0.000000e+00 : f32
    %129 = vector.shape_cast %102 : vector<1x256xi1> to vector<1x256xi1>
    %130 = vector.broadcast %129 : vector<1x256xi1> to vector<2x256xi1>
    %131 = vector.broadcast %cst_91 : f32 to vector<2x256xf32>
    %132 = arith.select %130, %128, %131 : vector<2x256xi1>, vector<2x256xf32>
    %c18 = arith.constant 18 : index
    %c0_92 = arith.constant 0 : index
    %133 = vector.load %arg16[%c18, %c0_92] : memref<50x256xf32, #tpu.memory_space<vmem>>, vector<2x256xf32>
    tpu.vector_store %arg16[%c18, %c0_92], %132 {strides = array<i32>} : memref<50x256xf32, #tpu.memory_space<vmem>>, vector<2x256xf32>,
    %c0_93 = arith.constant 0 : index
    %c126 = arith.constant 126 : index
    %134 = vector.load %arg13[%c0_93, %c126] : memref<2x418xf32, #tpu.memory_space<vmem>>, vector<2x256xf32>
    %cst_94 = arith.constant 0.000000e+00 : f32
    %135 = vector.shape_cast %80 : vector<1x256xi1> to vector<1x256xi1>
    %136 = vector.broadcast %135 : vector<1x256xi1> to vector<2x256xi1>
    %137 = vector.broadcast %cst_94 : f32 to vector<2x256xf32>
    %138 = arith.select %136, %134, %137 : vector<2x256xi1>, vector<2x256xf32>
    %c20_95 = arith.constant 20 : index
    %c0_96 = arith.constant 0 : index
    %139 = vector.load %arg16[%c20_95, %c0_96] : memref<50x256xf32, #tpu.memory_space<vmem>>, vector<2x256xf32>
    tpu.vector_store %arg16[%c20_95, %c0_96], %138 {strides = array<i32>} : memref<50x256xf32, #tpu.memory_space<vmem>>, vector<2x256xf32>,
    %c0_97 = arith.constant 0 : index
    %c127_98 = arith.constant 127 : index
    %140 = vector.load %arg13[%c0_97, %c127_98] : memref<2x418xf32, #tpu.memory_space<vmem>>, vector<2x256xf32>
    %cst_99 = arith.constant 0.000000e+00 : f32
    %141 = vector.shape_cast %20 : vector<1x256xi1> to vector<1x256xi1>
    %142 = vector.broadcast %141 : vector<1x256xi1> to vector<2x256xi1>
    %143 = vector.broadcast %cst_99 : f32 to vector<2x256xf32>
    %144 = arith.select %142, %140, %143 : vector<2x256xi1>, vector<2x256xf32>
    %c22 = arith.constant 22 : index
    %c0_100 = arith.constant 0 : index
    %145 = vector.load %arg16[%c22, %c0_100] : memref<50x256xf32, #tpu.memory_space<vmem>>, vector<2x256xf32>
    tpu.vector_store %arg16[%c22, %c0_100], %144 {strides = array<i32>} : memref<50x256xf32, #tpu.memory_space<vmem>>, vector<2x256xf32>,
    %c0_101 = arith.constant 0 : index
    %c128_102 = arith.constant 128 : index
    %146 = vector.load %arg13[%c0_101, %c128_102] : memref<2x418xf32, #tpu.memory_space<vmem>>, vector<2x256xf32>
    %c24_103 = arith.constant 24 : index
    %c0_104 = arith.constant 0 : index
    %147 = vector.load %arg16[%c24_103, %c0_104] : memref<50x256xf32, #tpu.memory_space<vmem>>, vector<2x256xf32>
    tpu.vector_store %arg16[%c24_103, %c0_104], %146 {strides = array<i32>} : memref<50x256xf32, #tpu.memory_space<vmem>>, vector<2x256xf32>,
    %c0_105 = arith.constant 0 : index
    %c129_106 = arith.constant 129 : index
    %148 = vector.load %arg13[%c0_105, %c129_106] : memref<2x418xf32, #tpu.memory_space<vmem>>, vector<2x256xf32>
    %cst_107 = arith.constant 0.000000e+00 : f32
    %149 = vector.shape_cast %30 : vector<1x256xi1> to vector<1x256xi1>
    %150 = vector.broadcast %149 : vector<1x256xi1> to vector<2x256xi1>
    %151 = vector.broadcast %cst_107 : f32 to vector<2x256xf32>
    %152 = arith.select %150, %148, %151 : vector<2x256xi1>, vector<2x256xf32>
    %c26 = arith.constant 26 : index
    %c0_108 = arith.constant 0 : index
    %153 = vector.load %arg16[%c26, %c0_108] : memref<50x256xf32, #tpu.memory_space<vmem>>, vector<2x256xf32>
    tpu.vector_store %arg16[%c26, %c0_108], %152 {strides = array<i32>} : memref<50x256xf32, #tpu.memory_space<vmem>>, vector<2x256xf32>,
    %c0_109 = arith.constant 0 : index
    %c130 = arith.constant 130 : index
    %154 = vector.load %arg13[%c0_109, %c130] : memref<2x418xf32, #tpu.memory_space<vmem>>, vector<2x256xf32>
    %cst_110 = arith.constant 0.000000e+00 : f32
    %155 = vector.shape_cast %102 : vector<1x256xi1> to vector<1x256xi1>
    %156 = vector.broadcast %155 : vector<1x256xi1> to vector<2x256xi1>
    %157 = vector.broadcast %cst_110 : f32 to vector<2x256xf32>
    %158 = arith.select %156, %154, %157 : vector<2x256xi1>, vector<2x256xf32>
    %c28_111 = arith.constant 28 : index
    %c0_112 = arith.constant 0 : index
    %159 = vector.load %arg16[%c28_111, %c0_112] : memref<50x256xf32, #tpu.memory_space<vmem>>, vector<2x256xf32>
    tpu.vector_store %arg16[%c28_111, %c0_112], %158 {strides = array<i32>} : memref<50x256xf32, #tpu.memory_space<vmem>>, vector<2x256xf32>,
    %c0_113 = arith.constant 0 : index
    %c142 = arith.constant 142 : index
    %160 = vector.load %arg13[%c0_113, %c142] : memref<2x418xf32, #tpu.memory_space<vmem>>, vector<2x256xf32>
    %cst_114 = arith.constant 0.000000e+00 : f32
    %161 = vector.shape_cast %80 : vector<1x256xi1> to vector<1x256xi1>
    %162 = vector.broadcast %161 : vector<1x256xi1> to vector<2x256xi1>
    %163 = vector.broadcast %cst_114 : f32 to vector<2x256xf32>
    %164 = arith.select %162, %160, %163 : vector<2x256xi1>, vector<2x256xf32>
    %c30 = arith.constant 30 : index
    %c0_115 = arith.constant 0 : index
    %165 = vector.load %arg16[%c30, %c0_115] : memref<50x256xf32, #tpu.memory_space<vmem>>, vector<2x256xf32>
    tpu.vector_store %arg16[%c30, %c0_115], %164 {strides = array<i32>} : memref<50x256xf32, #tpu.memory_space<vmem>>, vector<2x256xf32>,
    %c0_116 = arith.constant 0 : index
    %c143_117 = arith.constant 143 : index
    %166 = vector.load %arg13[%c0_116, %c143_117] : memref<2x418xf32, #tpu.memory_space<vmem>>, vector<2x256xf32>
    %cst_118 = arith.constant 0.000000e+00 : f32
    %167 = vector.shape_cast %20 : vector<1x256xi1> to vector<1x256xi1>
    %168 = vector.broadcast %167 : vector<1x256xi1> to vector<2x256xi1>
    %169 = vector.broadcast %cst_118 : f32 to vector<2x256xf32>
    %170 = arith.select %168, %166, %169 : vector<2x256xi1>, vector<2x256xf32>
    %c32_119 = arith.constant 32 : index
    %c0_120 = arith.constant 0 : index
    %171 = vector.load %arg16[%c32_119, %c0_120] : memref<50x256xf32, #tpu.memory_space<vmem>>, vector<2x256xf32>
    tpu.vector_store %arg16[%c32_119, %c0_120], %170 {strides = array<i32>} : memref<50x256xf32, #tpu.memory_space<vmem>>, vector<2x256xf32>,
    %c0_121 = arith.constant 0 : index
    %c144_122 = arith.constant 144 : index
    %172 = vector.load %arg13[%c0_121, %c144_122] : memref<2x418xf32, #tpu.memory_space<vmem>>, vector<2x256xf32>
    %c34 = arith.constant 34 : index
    %c0_123 = arith.constant 0 : index
    %173 = vector.load %arg16[%c34, %c0_123] : memref<50x256xf32, #tpu.memory_space<vmem>>, vector<2x256xf32>
    tpu.vector_store %arg16[%c34, %c0_123], %172 {strides = array<i32>} : memref<50x256xf32, #tpu.memory_space<vmem>>, vector<2x256xf32>,
    %c0_124 = arith.constant 0 : index
    %c145_125 = arith.constant 145 : index
    %174 = vector.load %arg13[%c0_124, %c145_125] : memref<2x418xf32, #tpu.memory_space<vmem>>, vector<2x256xf32>
    %cst_126 = arith.constant 0.000000e+00 : f32
    %175 = vector.shape_cast %30 : vector<1x256xi1> to vector<1x256xi1>
    %176 = vector.broadcast %175 : vector<1x256xi1> to vector<2x256xi1>
    %177 = vector.broadcast %cst_126 : f32 to vector<2x256xf32>
    %178 = arith.select %176, %174, %177 : vector<2x256xi1>, vector<2x256xf32>
    %c36 = arith.constant 36 : index
    %c0_127 = arith.constant 0 : index
    %179 = vector.load %arg16[%c36, %c0_127] : memref<50x256xf32, #tpu.memory_space<vmem>>, vector<2x256xf32>
    tpu.vector_store %arg16[%c36, %c0_127], %178 {strides = array<i32>} : memref<50x256xf32, #tpu.memory_space<vmem>>, vector<2x256xf32>,
    %c0_128 = arith.constant 0 : index
    %c146 = arith.constant 146 : index
    %180 = vector.load %arg13[%c0_128, %c146] : memref<2x418xf32, #tpu.memory_space<vmem>>, vector<2x256xf32>
    %cst_129 = arith.constant 0.000000e+00 : f32
    %181 = vector.shape_cast %102 : vector<1x256xi1> to vector<1x256xi1>
    %182 = vector.broadcast %181 : vector<1x256xi1> to vector<2x256xi1>
    %183 = vector.broadcast %cst_129 : f32 to vector<2x256xf32>
    %184 = arith.select %182, %180, %183 : vector<2x256xi1>, vector<2x256xf32>
    %c38 = arith.constant 38 : index
    %c0_130 = arith.constant 0 : index
    %185 = vector.load %arg16[%c38, %c0_130] : memref<50x256xf32, #tpu.memory_space<vmem>>, vector<2x256xf32>
    tpu.vector_store %arg16[%c38, %c0_130], %184 {strides = array<i32>} : memref<50x256xf32, #tpu.memory_space<vmem>>, vector<2x256xf32>,
    %c0_131 = arith.constant 0 : index
    %c158 = arith.constant 158 : index
    %186 = vector.load %arg13[%c0_131, %c158] : memref<2x418xf32, #tpu.memory_space<vmem>>, vector<2x256xf32>
    %cst_132 = arith.constant 0.000000e+00 : f32
    %187 = vector.shape_cast %80 : vector<1x256xi1> to vector<1x256xi1>
    %188 = vector.broadcast %187 : vector<1x256xi1> to vector<2x256xi1>
    %189 = vector.broadcast %cst_132 : f32 to vector<2x256xf32>
    %190 = arith.select %188, %186, %189 : vector<2x256xi1>, vector<2x256xf32>
    %c40 = arith.constant 40 : index
    %c0_133 = arith.constant 0 : index
    %191 = vector.load %arg16[%c40, %c0_133] : memref<50x256xf32, #tpu.memory_space<vmem>>, vector<2x256xf32>
    tpu.vector_store %arg16[%c40, %c0_133], %190 {strides = array<i32>} : memref<50x256xf32, #tpu.memory_space<vmem>>, vector<2x256xf32>,
    %c0_134 = arith.constant 0 : index
    %c159 = arith.constant 159 : index
    %192 = vector.load %arg13[%c0_134, %c159] : memref<2x418xf32, #tpu.memory_space<vmem>>, vector<2x256xf32>
    %cst_135 = arith.constant 0.000000e+00 : f32
    %193 = vector.shape_cast %20 : vector<1x256xi1> to vector<1x256xi1>
    %194 = vector.broadcast %193 : vector<1x256xi1> to vector<2x256xi1>
    %195 = vector.broadcast %cst_135 : f32 to vector<2x256xf32>
    %196 = arith.select %194, %192, %195 : vector<2x256xi1>, vector<2x256xf32>
    %c42 = arith.constant 42 : index
    %c0_136 = arith.constant 0 : index
    %197 = vector.load %arg16[%c42, %c0_136] : memref<50x256xf32, #tpu.memory_space<vmem>>, vector<2x256xf32>
    tpu.vector_store %arg16[%c42, %c0_136], %196 {strides = array<i32>} : memref<50x256xf32, #tpu.memory_space<vmem>>, vector<2x256xf32>,
    %c0_137 = arith.constant 0 : index
    %c160 = arith.constant 160 : index
    %198 = vector.load %arg13[%c0_137, %c160] : memref<2x418xf32, #tpu.memory_space<vmem>>, vector<2x256xf32>
    %c44 = arith.constant 44 : index
    %c0_138 = arith.constant 0 : index
    %199 = vector.load %arg16[%c44, %c0_138] : memref<50x256xf32, #tpu.memory_space<vmem>>, vector<2x256xf32>
    tpu.vector_store %arg16[%c44, %c0_138], %198 {strides = array<i32>} : memref<50x256xf32, #tpu.memory_space<vmem>>, vector<2x256xf32>,
    %c0_139 = arith.constant 0 : index
    %c161 = arith.constant 161 : index
    %200 = vector.load %arg13[%c0_139, %c161] : memref<2x418xf32, #tpu.memory_space<vmem>>, vector<2x256xf32>
    %cst_140 = arith.constant 0.000000e+00 : f32
    %201 = vector.shape_cast %30 : vector<1x256xi1> to vector<1x256xi1>
    %202 = vector.broadcast %201 : vector<1x256xi1> to vector<2x256xi1>
    %203 = vector.broadcast %cst_140 : f32 to vector<2x256xf32>
    %204 = arith.select %202, %200, %203 : vector<2x256xi1>, vector<2x256xf32>
    %c46 = arith.constant 46 : index
    %c0_141 = arith.constant 0 : index
    %205 = vector.load %arg16[%c46, %c0_141] : memref<50x256xf32, #tpu.memory_space<vmem>>, vector<2x256xf32>
    tpu.vector_store %arg16[%c46, %c0_141], %204 {strides = array<i32>} : memref<50x256xf32, #tpu.memory_space<vmem>>, vector<2x256xf32>,
    %c0_142 = arith.constant 0 : index
    %c162 = arith.constant 162 : index
    %206 = vector.load %arg13[%c0_142, %c162] : memref<2x418xf32, #tpu.memory_space<vmem>>, vector<2x256xf32>
    %cst_143 = arith.constant 0.000000e+00 : f32
    %207 = vector.shape_cast %102 : vector<1x256xi1> to vector<1x256xi1>
    %208 = vector.broadcast %207 : vector<1x256xi1> to vector<2x256xi1>
    %209 = vector.broadcast %cst_143 : f32 to vector<2x256xf32>
    %210 = arith.select %208, %206, %209 : vector<2x256xi1>, vector<2x256xf32>
    %c48 = arith.constant 48 : index
    %c0_144 = arith.constant 0 : index
    %211 = vector.load %arg16[%c48, %c0_144] : memref<50x256xf32, #tpu.memory_space<vmem>>, vector<2x256xf32>
    tpu.vector_store %arg16[%c48, %c0_144], %210 {strides = array<i32>} : memref<50x256xf32, #tpu.memory_space<vmem>>, vector<2x256xf32>,
    %c0_145 = arith.constant 0 : index
    %c0_146 = arith.constant 0 : index
    %212 = vector.load %arg16[%c0_145, %c0_146] : memref<50x256xf32, #tpu.memory_space<vmem>>, vector<50x256xf32>
    %213 = arith.truncf %212 : vector<50x256xf32> to vector<50x256xbf16>
    %c0_147 = arith.constant 0 : index
    %c0_148 = arith.constant 0 : index
    %214 = vector.load %arg7[%c0_147, %c0_148] : memref<4x50xbf16, #tpu.memory_space<vmem>>, vector<4x50xbf16>
    %cst_149 = arith.constant dense<0.000000e+00> : vector<4x256xf32>
    %215 = tpu.matmul %214, %213, %cst_149 {dimension_numbers = #tpu.dot_dimension_numbers<[1], [0], [0], [1], [0, 0, 1, 1], [], []>} : vector<4x50xbf16>, vector<50x256xbf16>, vector<4x256xf32> -> vector<4x256xf32>
    %c0_150 = arith.constant 0 : index
    %c0_151 = arith.constant 0 : index
    %216 = vector.load %arg8[%c0_150, %c0_151] : memref<4x1xf32, #tpu.memory_space<vmem>>, vector<4x1xf32>
    %217 = vector.broadcast %216 : vector<4x1xf32> to vector<4x256xf32>
    %218 = arith.addf %215, %217 : vector<4x256xf32>
    %cst_152 = arith.constant 0.000000e+00 : f32
    %219 = vector.broadcast %cst_152 : f32 to vector<4x256xf32>
    %220 = arith.maximumf %218, %219 : vector<4x256xf32>
    %cst_153 = arith.constant -3.000000e+38 : f32
    %221 = vector.broadcast %cst_153 : f32 to vector<4x128xf32>
    %c0_154 = arith.constant 0 : index
    %c0_155 = arith.constant 0 : index
    %222 = vector.load %arg14[%c0_154, %c0_155] : memref<4x401xf32, #tpu.memory_space<vmem>>, vector<4x128xf32>
    tpu.vector_store %arg14[%c0_154, %c0_155], %221 {strides = array<i32>} : memref<4x401xf32, #tpu.memory_space<vmem>>, vector<4x128xf32>,
    %cst_156 = arith.constant -3.000000e+38 : f32
    %223 = vector.broadcast %cst_156 : f32 to vector<4x17xf32>
    %c0_157 = arith.constant 0 : index
    %c384_158 = arith.constant 384 : index
    %224 = vector.load %arg14[%c0_157, %c384_158] : memref<4x401xf32, #tpu.memory_space<vmem>>, vector<4x17xf32>
    tpu.vector_store %arg14[%c0_157, %c384_158], %223 {strides = array<i32>} : memref<4x401xf32, #tpu.memory_space<vmem>>, vector<4x17xf32>,
    %225 = arith.extf %2 : vector<4x256xbf16> to vector<4x256xf32>
    %c0_159 = arith.constant 0 : index
    %c128_160 = arith.constant 128 : index
    %226 = vector.load %arg14[%c0_159, %c128_160] : memref<4x401xf32, #tpu.memory_space<vmem>>, vector<4x256xf32>
    tpu.vector_store %arg14[%c0_159, %c128_160], %225 {strides = array<i32>} : memref<4x401xf32, #tpu.memory_space<vmem>>, vector<4x256xf32>,
    %c0_161 = arith.constant 0 : index
    %c111_162 = arith.constant 111 : index
    %227 = vector.load %arg14[%c0_161, %c111_162] : memref<4x401xf32, #tpu.memory_space<vmem>>, vector<4x256xf32>
    %cst_163 = arith.constant -3.000000e+38 : f32
    %228 = vector.shape_cast %20 : vector<1x256xi1> to vector<1x256xi1>
    %229 = vector.broadcast %228 : vector<1x256xi1> to vector<4x256xi1>
    %230 = vector.broadcast %cst_163 : f32 to vector<4x256xf32>
    %231 = arith.select %229, %227, %230 : vector<4x256xi1>, vector<4x256xf32>
    %c0_164 = arith.constant 0 : index
    %c112_165 = arith.constant 112 : index
    %232 = vector.load %arg14[%c0_164, %c112_165] : memref<4x401xf32, #tpu.memory_space<vmem>>, vector<4x256xf32>
    %233 = arith.maximumf %231, %232 : vector<4x256xf32>
    %c0_166 = arith.constant 0 : index
    %c113_167 = arith.constant 113 : index
    %234 = vector.load %arg14[%c0_166, %c113_167] : memref<4x401xf32, #tpu.memory_space<vmem>>, vector<4x256xf32>
    %cst_168 = arith.constant -3.000000e+38 : f32
    %235 = vector.shape_cast %30 : vector<1x256xi1> to vector<1x256xi1>
    %236 = vector.broadcast %235 : vector<1x256xi1> to vector<4x256xi1>
    %237 = vector.broadcast %cst_168 : f32 to vector<4x256xf32>
    %238 = arith.select %236, %234, %237 : vector<4x256xi1>, vector<4x256xf32>
    %239 = arith.maximumf %233, %238 : vector<4x256xf32>
    %c0_169 = arith.constant 0 : index
    %c127_170 = arith.constant 127 : index
    %240 = vector.load %arg14[%c0_169, %c127_170] : memref<4x401xf32, #tpu.memory_space<vmem>>, vector<4x256xf32>
    %cst_171 = arith.constant -3.000000e+38 : f32
    %241 = vector.shape_cast %20 : vector<1x256xi1> to vector<1x256xi1>
    %242 = vector.broadcast %241 : vector<1x256xi1> to vector<4x256xi1>
    %243 = vector.broadcast %cst_171 : f32 to vector<4x256xf32>
    %244 = arith.select %242, %240, %243 : vector<4x256xi1>, vector<4x256xf32>
    %245 = arith.maximumf %239, %244 : vector<4x256xf32>
    %c0_172 = arith.constant 0 : index
    %c128_173 = arith.constant 128 : index
    %246 = vector.load %arg14[%c0_172, %c128_173] : memref<4x401xf32, #tpu.memory_space<vmem>>, vector<4x256xf32>
    %247 = arith.maximumf %245, %246 : vector<4x256xf32>
    %c0_174 = arith.constant 0 : index
    %c129_175 = arith.constant 129 : index
    %248 = vector.load %arg14[%c0_174, %c129_175] : memref<4x401xf32, #tpu.memory_space<vmem>>, vector<4x256xf32>
    %cst_176 = arith.constant -3.000000e+38 : f32
    %249 = vector.shape_cast %30 : vector<1x256xi1> to vector<1x256xi1>
    %250 = vector.broadcast %249 : vector<1x256xi1> to vector<4x256xi1>
    %251 = vector.broadcast %cst_176 : f32 to vector<4x256xf32>
    %252 = arith.select %250, %248, %251 : vector<4x256xi1>, vector<4x256xf32>
    %253 = arith.maximumf %247, %252 : vector<4x256xf32>
    %c0_177 = arith.constant 0 : index
    %c143_178 = arith.constant 143 : index
    %254 = vector.load %arg14[%c0_177, %c143_178] : memref<4x401xf32, #tpu.memory_space<vmem>>, vector<4x256xf32>
    %cst_179 = arith.constant -3.000000e+38 : f32
    %255 = vector.shape_cast %20 : vector<1x256xi1> to vector<1x256xi1>
    %256 = vector.broadcast %255 : vector<1x256xi1> to vector<4x256xi1>
    %257 = vector.broadcast %cst_179 : f32 to vector<4x256xf32>
    %258 = arith.select %256, %254, %257 : vector<4x256xi1>, vector<4x256xf32>
    %259 = arith.maximumf %253, %258 : vector<4x256xf32>
    %c0_180 = arith.constant 0 : index
    %c144_181 = arith.constant 144 : index
    %260 = vector.load %arg14[%c0_180, %c144_181] : memref<4x401xf32, #tpu.memory_space<vmem>>, vector<4x256xf32>
    %261 = arith.maximumf %259, %260 : vector<4x256xf32>
    %c0_182 = arith.constant 0 : index
    %c145_183 = arith.constant 145 : index
    %262 = vector.load %arg14[%c0_182, %c145_183] : memref<4x401xf32, #tpu.memory_space<vmem>>, vector<4x256xf32>
    %cst_184 = arith.constant -3.000000e+38 : f32
    %263 = vector.shape_cast %30 : vector<1x256xi1> to vector<1x256xi1>
    %264 = vector.broadcast %263 : vector<1x256xi1> to vector<4x256xi1>
    %265 = vector.broadcast %cst_184 : f32 to vector<4x256xf32>
    %266 = arith.select %264, %262, %265 : vector<4x256xi1>, vector<4x256xf32>
    %267 = arith.maximumf %261, %266 : vector<4x256xf32>
    %c0_185 = arith.constant 0 : index
    %c0_186 = arith.constant 0 : index
    %268 = vector.load %arg9[%c0_185, %c0_186] : memref<8x4xbf16, #tpu.memory_space<vmem>>, vector<8x4xbf16>
    %269 = arith.truncf %267 : vector<4x256xf32> to vector<4x256xbf16>
    %cst_187 = arith.constant dense<0.000000e+00> : vector<8x256xf32>
    %270 = tpu.matmul %268, %269, %cst_187 {dimension_numbers = #tpu.dot_dimension_numbers<[1], [0], [0], [1], [0, 0, 1, 1], [], []>} : vector<8x4xbf16>, vector<4x256xbf16>, vector<8x256xf32> -> vector<8x256xf32>
    %c0_188 = arith.constant 0 : index
    %c0_189 = arith.constant 0 : index
    %271 = vector.load %arg10[%c0_188, %c0_189] : memref<8x1xf32, #tpu.memory_space<vmem>>, vector<8x1xf32>
    %272 = vector.broadcast %271 : vector<8x1xf32> to vector<8x256xf32>
    %273 = arith.addf %270, %272 : vector<8x256xf32>
    %cst_190 = arith.constant 0.000000e+00 : f32
    %274 = vector.broadcast %cst_190 : f32 to vector<8x256xf32>
    %275 = arith.maximumf %273, %274 : vector<8x256xf32>
    %c0_191 = arith.constant 0 : index
    %c0_192 = arith.constant 0 : index
    %c0_193 = arith.constant 0 : index
    %276 = vector.load %arg11[%c0_191, %c0_192, %c0_193] : memref<1x28x256xf32, #tpu.memory_space<vmem>>, vector<1x8x256xf32>
    %277 = vector.shape_cast %276 : vector<1x8x256xf32> to vector<8x256xf32>
    %278 = vector.shape_cast %10 : vector<8x256xf32> to vector<1x8x256xf32>
    tpu.vector_store %arg11[%c0_191, %c0_192, %c0_193], %278 {strides = array<i32>} : memref<1x28x256xf32, #tpu.memory_space<vmem>>, vector<1x8x256xf32>,
    %c0_194 = arith.constant 0 : index
    %c8_195 = arith.constant 8 : index
    %c0_196 = arith.constant 0 : index
    %279 = vector.load %arg11[%c0_194, %c8_195, %c0_196] : memref<1x28x256xf32, #tpu.memory_space<vmem>>, vector<1x8x256xf32>
    %280 = vector.shape_cast %279 : vector<1x8x256xf32> to vector<8x256xf32>
    %281 = vector.shape_cast %72 : vector<8x256xf32> to vector<1x8x256xf32>
    tpu.vector_store %arg11[%c0_194, %c8_195, %c0_196], %281 {strides = array<i32>} : memref<1x28x256xf32, #tpu.memory_space<vmem>>, vector<1x8x256xf32>,
    %c0_197 = arith.constant 0 : index
    %c16_198 = arith.constant 16 : index
    %c0_199 = arith.constant 0 : index
    %282 = vector.load %arg11[%c0_197, %c16_198, %c0_199] : memref<1x28x256xf32, #tpu.memory_space<vmem>>, vector<1x4x256xf32>
    %283 = vector.shape_cast %282 : vector<1x4x256xf32> to vector<4x256xf32>
    %284 = vector.shape_cast %220 : vector<4x256xf32> to vector<1x4x256xf32>
    tpu.vector_store %arg11[%c0_197, %c16_198, %c0_199], %284 {strides = array<i32>} : memref<1x28x256xf32, #tpu.memory_space<vmem>>, vector<1x4x256xf32>,
    %c0_200 = arith.constant 0 : index
    %c20_201 = arith.constant 20 : index
    %c0_202 = arith.constant 0 : index
    %285 = vector.load %arg11[%c0_200, %c20_201, %c0_202] : memref<1x28x256xf32, #tpu.memory_space<vmem>>, vector<1x8x256xf32>
    %286 = vector.shape_cast %285 : vector<1x8x256xf32> to vector<8x256xf32>
    %287 = vector.shape_cast %275 : vector<8x256xf32> to vector<1x8x256xf32>
    tpu.vector_store %arg11[%c0_200, %c20_201, %c0_202], %287 {strides = array<i32>} : memref<1x28x256xf32, #tpu.memory_space<vmem>>, vector<1x8x256xf32>,
    return
  }
  func.func @transform_0(%arg0: i32) -> (i32, i32) {
    %c0_i32 = arith.constant 0 : i32
    %c0_i32_0 = arith.constant 0 : i32
    %c0_i32_1 = arith.constant 0 : i32
    return %c0_i32, %c0_i32_0 : i32, i32
  }
  func.func @transform_1(%arg0: i32) -> (i32, i32, i32) {
    %c0_i32 = arith.constant 0 : i32
    %c0_i32_0 = arith.constant 0 : i32
    %c0_i32_1 = arith.constant 0 : i32
    return %arg0, %c0_i32, %c0_i32_0 : i32, i32, i32
  }
  func.func @transform_2(%arg0: i32) -> (i32, i32) {
    %c0_i32 = arith.constant 0 : i32
    %c0_i32_0 = arith.constant 0 : i32
    %c0_i32_1 = arith.constant 0 : i32
    return %c0_i32, %c0_i32_0 : i32, i32
  }
  func.func @transform_3(%arg0: i32) -> (i32, i32) {
    %c0_i32 = arith.constant 0 : i32
    %c0_i32_0 = arith.constant 0 : i32
    %c0_i32_1 = arith.constant 0 : i32
    return %c0_i32, %c0_i32_0 : i32, i32
  }
  func.func @transform_4(%arg0: i32) -> (i32, i32) {
    %c0_i32 = arith.constant 0 : i32
    %c0_i32_0 = arith.constant 0 : i32
    %c0_i32_1 = arith.constant 0 : i32
    return %c0_i32, %c0_i32_0 : i32, i32
  }
  func.func @transform_5(%arg0: i32) -> (i32, i32) {
    %c0_i32 = arith.constant 0 : i32
    %c0_i32_0 = arith.constant 0 : i32
    %c0_i32_1 = arith.constant 0 : i32
    return %c0_i32, %c0_i32_0 : i32, i32
  }
  func.func @transform_6(%arg0: i32) -> (i32, i32) {
    %c0_i32 = arith.constant 0 : i32
    %c0_i32_0 = arith.constant 0 : i32
    %c0_i32_1 = arith.constant 0 : i32
    return %c0_i32, %c0_i32_0 : i32, i32
  }
  func.func @transform_7(%arg0: i32) -> (i32, i32) {
    %c0_i32 = arith.constant 0 : i32
    %c0_i32_0 = arith.constant 0 : i32
    %c0_i32_1 = arith.constant 0 : i32
    return %c0_i32, %c0_i32_0 : i32, i32
  }
  func.func @transform_8(%arg0: i32) -> (i32, i32) {
    %c0_i32 = arith.constant 0 : i32
    %c0_i32_0 = arith.constant 0 : i32
    %c0_i32_1 = arith.constant 0 : i32
    return %c0_i32, %c0_i32_0 : i32, i32
  }
  func.func @transform_9(%arg0: i32) -> (i32, i32) {
    %c0_i32 = arith.constant 0 : i32
    %c0_i32_0 = arith.constant 0 : i32
    %c0_i32_1 = arith.constant 0 : i32
    return %c0_i32, %c0_i32_0 : i32, i32
  }
  func.func @transform_10(%arg0: i32) -> (i32, i32, i32) {
    %c0_i32 = arith.constant 0 : i32
    %c0_i32_0 = arith.constant 0 : i32
    %c0_i32_1 = arith.constant 0 : i32
    return %arg0, %c0_i32, %c0_i32_0 : i32, i32, i32
  }
}

</mosaic_0001>

<bundles_post_ra>
// kernel: tpu_custom_call.1
= control target key start
LH: loop header
LB: loop body
LE: loop exit
PB: predicated region body
PF: predicated region fallthrough
CT: control target
= control target key end

     0   :  { %s2204_s13 = smov 0   ;;  %s3088_s0 = inlined_call_operand.vmem [shape: s32[1,256], index: 0, kind: input, shape index: {}]   ;;  %s3089_s1 = inlined_call_operand.vmem [shape: bf16[2,4,256], index: 1, kind: input, shape index: {}]   ;;  %s3090_s2 = inlined_call_operand.vmem [shape: bf16[14,4], index: 2, kind: input, shape index: {}]   ;;  %s3091_s3 = inlined_call_operand.vmem [shape: f32[14,1], index: 3, kind: input, shape index: {}]   ;;  %s3092_s4 = inlined_call_operand.vmem [shape: bf16[8,36], index: 4, kind: input, shape index: {}]   ;;  %s3093_s5 = inlined_call_operand.vmem [shape: f32[8,1], index: 5, kind: input, shape index: {}]   ;;  %s3094_s6 = inlined_call_operand.vmem [shape: bf16[4,50], index: 6, kind: input, shape index: {}]   ;;  %s3095_s7 = inlined_call_operand.vmem [shape: f32[4,1], index: 7, kind: input, shape index: {}]   ;;  %s3096_s8 = inlined_call_operand.vmem [shape: bf16[8,4], index: 8, kind: input, shape index: {}]   ;;  %s3097_s9 = inlined_call_operand.vmem [shape: f32[8,1], index: 9, kind: input, shape index: {}]   ;;  %s3098_s10 = inlined_call_operand.vmem [shape: f32[2,28,256], index: 10, kind: output, shape index: {}]  }
   0x1 LB: > { %s1985_s14 = sadd.s32 4294967295, %s2119_s13   ;;  %p1989_p0 = scmp.ge.s32.totalorder %s2119_s13, 1  ;;  %s2119_s13 = sphi %s2204_s13, %s20_s13  }
   0x2   : > { %p312_p1 = scmp.lt.s32.totalorder %s2119_s13, 3 }
   0x4   : > { %p313_p2 = pnand %p1989_p0, %p312_p1 }
   0x6   : > { %316 = sbr.rel (%p313_p2) target bundleno = 800 (0x320), region = 60 }
   0xd   : > { %p350_p3 = scmp.lt.s32.totalorder %s1985_s14, 1  ;;  %v386_v0 = vlaneseq  ;;  %v2121_v1 = vmov 1983009808   ;;  %v3111_v3 = vmov 0   ;;  %v366_v5 = vld [vmem:[%s3091_s3 + $0x8] sm:$0x3f] }
   0xe   : > { %v384_v2 = vunpack.c.l.s4 %v2121_v1  ;;  %434 = vmatprep.mubr.bf16.mxu0 %v3111_v3  ;;  %2045 = vset.pattern.permute.xlu0 %v3111_v3  ;;  %vm450_vm0 = vcmask 134144   ;;  %v2123_v7 = vmov 0.0   ;;  %v2124_v8 = vmov -3e+38   ;;  %v2087_v15 = vld [vmem:[%s3090_s2] sm:$0x7f]  }
   0xf   : > { %s3171_s14 = smov (!%p350_p3, %s1985_s14), 1  ;;  %v2216_v4 = vshrl.u32 %v386_v0, 7  ;;  %722 = vmatprep.mubr.bf16.mxu1 %v3111_v3  ;;  %2086 = vset.pattern.permute.xlu1 %v3111_v3  ;;  %449 = vst [vmem:[#allocation2] sm:$0xf] %v2123_v7  ;;  %733 = vst [vmem:[#allocation3] sm:$0x3] %v2123_v7 }
  0x10   : > { %v385_v6 = vunpack.c.0.s8 %v384_v2  ;;  %374 = vperm.xlu0 %2045, %v366_v5   ;;  %s2007_s17 = sshll.u32 %s3171_s14, 2  ;;  %451 = vst.msk [vmem:[#allocation2 + $0xc] sm:$0xf] %vm450_vm0, %v2123_v7  ;;  %1730 = vst [vmem:[#allocation4] sm:$0xf] %v2124_v8  ;;  %vm3116_vm1 = vcmask 1041408  }
  0x11   : > { %1731 = vst.msk [vmem:[#allocation4 + $0xc] sm:$0xf] %vm450_vm0, %v2124_v8  ;;  %s354_s20 = scalar_lea.vmem %s3089_s1, %s2007_s17  ;;  %vm3115_vm2 = vcmask 31744   ;;  %s2125_s23 = smov 127   ;;  %vm734_vm3 = vcmask 271360   ;;  %vm551_vm6 = vcmask 7168  }
  0x12   : > { %v2228_v9 = vsub.s32 %v385_v6, %v2216_v4  ;;  %v362_v10 = vld [vmem:[%s354_s20] sm:$0xf]  ;;  %s3101_s24 = smov 113   ;;  %s3105_s25 = smov 112   ;;  %735 = vst.msk [vmem:[#allocation3 + $0x6] sm:$0x3] %vm734_vm3, %v2123_v7 }
  0x13   : > { %v1732_v12 = vunpack.c.l.bf16 %v362_v10  ;;  %s3099_s26 = smov 111   ;;  %s2129_s27 = smov 17   ;;  %vm3118_vm9 = vcmask 138240   ;;  %vm531_vm10 = vcmask 121856   ;;  %vm3119_vm13 = vcmask 130048  }
  0x14   : > { %v389_v11 = vrot.slane %v362_v10, %v2228_v9  ;;  %s2130_s28 = smov 16   ;;  %s2131_s29 = smov 15   ;;  %vm3117_vm14 = vcmask 916480   ;;  %vm609_vm15 = vcmask 924672   ;;  %vm3120_vm0 = vcmask 1039360  }
  0x15   : > { %1733 = vst [vmem:[#allocation4 + $0x4] sm:$0xff] %v1732_v12  ;;  %s2132_s30 = smov 1   ;;  %v2250_v24 = vcombine.high %v1732_v12, %v1732_v12  ;;  %s2133_s11 = smov 33   ;;  %vm648_vm3 = vcmask 908288  }
  0x16   : > { %v390_v13 = vcombine.high %v389_v11, %v389_v11  ;;  %v397_v14 = vsel %vm3116_vm1, %v389_v11, 0  ;;  %s2134_s12 = smov 31   ;;  %s2135_s15 = smov 18  }
  0x17   : > { %v573_v16 = vld [vmem:[#allocation2 + $0xc] sm:$0xf]  ;;  %3121 = vst [vmem:[#allocation7_spill] sm:$0xff] %v2250_v24  ;;  %v2253_v25 = vpack.i.bf16 %v2250_v24, %v1732_v12  ;;  %s2136_s16 = smov 34   ;;  %s2137_s17 = smov 32  }
  0x18   : > { %1995 = vmatprep.subr.msk.bf16.mxu0 %vm3116_vm1, %v390_v13  ;;  %581 = vrot.lane.b32.xlu0 %v573_v16, %s2125_s23  ;;  %v2088_v17 = vld [vmem:[#allocation2 + $0xc] ss:$0 sps:$4 sm:$0xff]   ;;  %v2257_v26 = vld [vmem:[#allocation4 + $0xc] sm:$0xf]  ;;  %s2138_s18 = smov 2   ;;  %s2139_s19 = smov 30  }
  0x19   : > { %403 = vmatpush1.bf16.msra.mxu0 %v397_v14  ;;  %v599_v18 = vld [vmem:[#allocation2 + $0xc] sm:$0xf]  ;;  %s2140_s20 = smov 114   ;;  %s2141_s21 = smov 14  }
  0x1a   : > { %607 = vrot.lane.b32.xlu1 %v599_v18, %s3101_s24  ;;  %v638_v20 = vld [vmem:[#allocation2 + $0xc] sm:$0xf]  ;;  %s3103_s22 = smov 97  }
  0x1c   : > { %1996 = vmatmul.mubr.msk.bf16.vlgmr.msra.gmra.mrb[0].mxu0 %vm3115_vm2, %v2087_v15  ;;  %628 = vrot.lane.b32.xlu0 %v2088_v17, %s3105_s25  ;;  %v1734_v19 = vld [vmem:[#allocation4] sm:$0xff]  ;;  %v1735_v23 = vld [vmem:[#allocation4 + $0x8] sm:$0xf]  ;;  %vm886_vm2 = vcmask 252928  }
  0x1d   : > { %1719 = vmatprep.mubr.bf16.mxu0 %v3111_v3  ;;  %v1738_v21 = vcombine.high %v1734_v19, %v1734_v19  ;;  %v2576_v3 = vsub.s32 0, %v2216_v4 }
  0x1f   : > { %v2046_v22 = vpack.i.bf16 %v1738_v21, %v1734_v19 }
  0x20   : > { %646 = vrot.lane.b32.xlu0 %v638_v20, %s3099_s26 }
  0x21   : > { %2047 = vrot.lane.b32.xlu1 %v2046_v22, %s2129_s27 }
  0x24   : > { %1743 = vrot.lane.b32.xlu0 %v1735_v23, %s2129_s27 }
  0x25   : > { %2052 = vrot.lane.b32.xlu1 %v2046_v22, %s2130_s28 }
  0x28   : > { %1755 = vrot.lane.b32.xlu0 %v1735_v23, %s2130_s28 }
  0x29   : > { %2057 = vrot.lane.b32.xlu1 %v2046_v22, %s2131_s29 }
  0x2c   : > { %1767 = vrot.lane.b32.xlu0 %v1735_v23, %s2131_s29 }
  0x2d   : > { %1781 = vrot.lane.b32.xlu1 %v1735_v23, %s2132_s30 }
  0x30   : > { %2062 = vrot.lane.b32.xlu0 %v2046_v22, %s2132_s30 }
  0x31   : > { %1803 = vrot.lane.b32.xlu1 %v2257_v26, %s2125_s23 }
  0x34   : > { %2067 = vrot.lane.b32.xlu0 %v2253_v25, %s2125_s23 }
  0x8f   : > { %v375_v28 = vpop.permute.xlu0 %374 }
  0x93   : > { %v2423_v22 = vpop.permute.xlu0 %581 }
  0xef   : > { %v2261_v27 = vpop.f32.mrb[0].mxu0 }
  0xf0   : > { %3122 = vst [vmem:[#allocation8_spill] sm:$0xff] %v2261_v27  ;;  %v2263_v29 = vpop.f32.mrb[1].mxu0 }
  0xf1   : > { %3123 = vst [vmem:[#allocation9_spill] sm:$0xff] %v2263_v29  ;;  %v440_v30 = vpop.f32.mrb[2].mxu0 }
  0xf2   : > { %v441_v31 = vadd.f32 %v440_v30, %v375_v28  ;;  %v442_v32 = vpop.f32.mrb[3].mxu0 }
  0xf3   : > { %v443_v33 = vadd.f32 %v442_v32, %v375_v28 }
  0xf4   : > { %v447_v34 = vmax.f32 %v441_v31, 0.0 }
  0xf5   : > { %v448_v35 = vmax.f32 %v443_v33, 0.0 }
  0xf6   : > { %v2112_v57 = vcombine.low %v447_v34, %v447_v34 }
  0xf7   : > { %v454_v36 = vcombine.low %v447_v34, %v448_v35  ;;  %v736_v37 = vcombine.high %v447_v34, %v448_v35  ;;  %v2265_v38 = vcombine.low %v448_v35, %v448_v35  ;;  %v2446_v34 = vpop.permute.xlu0 %628 }
  0xf9   : > { %456 = vst [vmem:[#allocation2 + $0x4] sm:$0xff] %v454_v36  ;;  %570 = vst [vmem:[#allocation5 + $0x20] sm:$0xf] %v454_v36 }
  0xfa   : > { %1999 = vst.sshfl [vmem:[#allocation3 + $0x2] sm:$0x33 pattern:$0x76325410] %v736_v37  ;;  %571 = vst [vmem:[#allocation5 + $0x28] sm:$0xf] %v2265_v38 }
 0x100   : > { %v541_v40 = vld [vmem:[#allocation2 + $0x8] sm:$0xf]  ;;  %v457_v42 = vld [vmem:[#allocation2] sm:$0xff] }
 0x101   : > { %v2000_v39 = vld.sshfl [vmem:[#allocation3 + $0x2] sm:$0x33 pattern:$0x76325410]  ;;  %549 = vrot.lane.b32.xlu1 %v541_v40, %s2132_s30  ;;  %474 = vrot.lane.b32.xlu0 %v457_v42, %s2129_s27  ;;  %v458_v43 = vld [vmem:[#allocation2 + $0x8] sm:$0xf]  ;;  %v473_v44 = vcombine.high %v457_v42, %v457_v42  ;;  %v493_v47 = vcombine.low %v457_v42, %v457_v42  ;;  %v2468_v40 = vpop.permute.xlu1 %607 }
 0x102   : > { %v1211_v41 = vcombine.high %v2000_v39, %v2000_v39  ;;  %1214 = vst [vmem:[#allocation6 + $0x30] sm:$0x3] %v2000_v39  ;;  %v509_v45 = vld [vmem:[#allocation2 + $0x8] sm:$0xf]  ;;  %v2284_v48 = vld [vmem:[#allocation3] sm:$0x3f] }
 0x103   : > { %v2092_v46 = vld [vmem:[#allocation2 + $0x8] ss:$0 sps:$4 sm:$0xff]   ;;  %v2288_v49 = vld [vmem:[#allocation3] sm:$0x3f]  ;;  %v2294_v50 = vrot.slane %v2284_v48, %v2228_v9 }
 0x104   : > { %1215 = vst [vmem:[#allocation6 + $0x38] sm:$0x3] %v1211_v41  ;;  %v2298_v51 = vrot.slane %v2288_v49, %v2228_v9  ;;  %v2300_v52 = vld [vmem:[#allocation3] sm:$0x3f]  ;;  %v2472_v41 = vpop.permute.xlu0 %646 }
 0x105   : > { %545 = vrot.lane.b32.xlu1 %v457_v42, %s2132_s30  ;;  %603 = vrot.lane.b32.xlu0 %v454_v36, %s3101_s24  ;;  %v2304_v53 = vld [vmem:[#allocation3] sm:$0x3f]  ;;  %v2310_v54 = vrot.slane %v2300_v52, %v2228_v9 }
 0x106   : > { %v2314_v55 = vrot.slane %v2304_v53, %v2228_v9  ;;  %v2318_v56 = vld [vmem:[#allocation3] sm:$0x3f] }
 0x107   : > { %v2324_v58 = vrot.slane %v2318_v56, %v2228_v9  ;;  %v2326_v59 = vld [vmem:[#allocation3] sm:$0x3f] }
 0x108   : > { %v2329_v60 = vld [vmem:[#allocation3] sm:$0x3f]  ;;  %v2335_v61 = vrot.slane %v2326_v59, %v2228_v9 }
 0x109   : > { %478 = vrot.lane.b32.xlu1 %v458_v43, %s2129_s27  ;;  %642 = vrot.lane.b32.xlu0 %v454_v36, %s3099_s26  ;;  %v2339_v62 = vrot.slane %v2329_v60, %v2228_v9  ;;  %v2341_v63 = vld [vmem:[#allocation3] sm:$0x3f]  ;;  %v793_v43 = vcombine.high %v2284_v48, %v2284_v48  ;;  %v879_v48 = vcombine.high %v2298_v51, %v2298_v51 }
 0x10a   : > { %v2345_v0 = vld [vmem:[#allocation3 + $0x2] sm:$0x3f]  ;;  %v2351_v1 = vrot.slane %v2341_v63, %v2228_v9 }
 0x10b   : > { %v2355_v2 = vrot.slane %v2345_v0, %v2228_v9  ;;  %v2359_v5 = vld [vmem:[#allocation3 + $0x2] sm:$0x3f]  ;;  %v1142_v29 = vcombine.high %v2339_v62, %v2339_v62 }
 0x10c   : > { %v2365_v6 = vrot.slane %v2359_v5, %v2228_v9  ;;  %v2367_v7 = vld [vmem:[#allocation3] sm:$0x3f] }
 0x10d   : > { %529 = vrot.lane.b32.xlu1 %v509_v45, %s2131_s29  ;;  %547 = vrot.lane.b32.xlu0 %v473_v44, %s2132_s30  ;;  %v2371_v8 = vld [vmem:[#allocation3 + $0x2] sm:$0x3f]  ;;  %v2377_v10 = vrot.slane %v2367_v7, %v2228_v9  ;;  %v2485_v45 = vpop.permute.xlu1 %2047 }
 0x10e   : > { %v2381_v11 = vrot.slane %v2371_v8, %v2228_v9  ;;  %v2383_v12 = vld [vmem:[#allocation3] sm:$0x3f] }
 0x10f   : > { %v2387_v13 = vld [vmem:[#allocation3 + $0x2] sm:$0x3f]  ;;  %v2393_v14 = vrot.slane %v2383_v12, %v2228_v9 }
 0x110   : > { %v2397_v15 = vrot.slane %v2387_v13, %v2228_v9  ;;  %v2399_v16 = vld [vmem:[#allocation3 + $0x2] sm:$0x3f] }
 0x111   : > { %497 = vrot.lane.b32.xlu1 %v457_v42, %s2130_s28  ;;  %476 = vrot.lane.b32.xlu0 %v473_v44, %s2129_s27  ;;  %v2403_v17 = vld [vmem:[#allocation3 + $0x2] sm:$0x3f]  ;;  %v2409_v18 = vrot.slane %v2399_v16, %v2228_v9  ;;  %v1256_v27 = vcombine.high %v2399_v16, %v2399_v16  ;;  %v1295_v16 = vcombine.high %v2359_v5, %v2359_v5 }
 0x112   : > { %v2413_v19 = vrot.slane %v2403_v17, %v2228_v9  ;;  %v2415_v20 = vld [vmem:[#allocation3] sm:$0x3f] }
 0x113   : > { %v2419_v21 = vld [vmem:[#allocation3 + $0x2] sm:$0x3f]  ;;  %v2427_v23 = vrot.slane %v2415_v20, %v2228_v9 }
 0x114   : > { %v1380_v28 = vrot.slane %v2419_v21, %v2228_v9  ;;  %v2431_v30 = vld [vmem:[#allocation3 + $0x2] sm:$0x3f] }
 0x115   : > { %525 = vrot.lane.b32.xlu1 %v457_v42, %s2131_s29  ;;  %527 = vrot.lane.b32.xlu0 %v473_v44, %s2131_s29  ;;  %v2435_v31 = vld [vmem:[#allocation3 + $0x2] sm:$0x3f]  ;;  %v2440_v32 = vrot.slane %v2431_v30, %v2228_v9  ;;  %v808_v44 = vcombine.high %v2294_v50, %v2294_v50 }
 0x116   : > { %v2444_v33 = vrot.slane %v2435_v31, %v2228_v9  ;;  %v2448_v35 = vld [vmem:[#allocation3 + $0x2] sm:$0x3f] }
 0x117   : > { %v2458_v37 = vrot.slane %v2448_v35, %v2228_v9  ;;  %v2464_v39 = vld [vmem:[#allocation3 + $0x2] sm:$0x3f] }
 0x118   : > { %v2476_v42 = vrot.slane %v2464_v39, %v2228_v9 }
 0x119   : > { %577 = vrot.lane.b32.xlu1 %v454_v36, %s2125_s23  ;;  %499 = vrot.lane.b32.xlu0 %v2092_v46, %s2130_s28  ;;  %v807_v46 = vrot.slane %v793_v43, %v2228_v9  ;;  %v963_v43 = vcombine.high %v2310_v54, %v2310_v54 }
 0x11d   : > { %626 = vrot.lane.b32.xlu1 %v454_v36, %s3105_s25  ;;  %495 = vrot.lane.b32.xlu0 %v493_v47, %s2130_s28  ;;  %v2452_v36 = vld [vmem:[#allocation3 + $0x2] sm:$0x3f]  ;;  %v864_v47 = vcombine.high %v2288_v49, %v2288_v49 }
 0x121   : > { %579 = vrot.lane.b32.xlu1 %v2265_v38, %s2125_s23  ;;  %605 = vrot.lane.b32.xlu0 %v2265_v38, %s3101_s24 }
 0x125   : > { %809 = vrot.lane.b32.xlu1 %v2294_v50, %s2133_s11  ;;  %880 = vrot.lane.b32.xlu0 %v2298_v51, %s2134_s12  ;;  %v878_v50 = vrot.slane %v864_v47, %v2228_v9  ;;  %v1002_v47 = vcombine.high %v2314_v55, %v2314_v55 }
 0x129   : > { %964 = vrot.lane.b32.xlu1 %v2310_v54, %s2135_s15  ;;  %1003 = vrot.lane.b32.xlu0 %v2314_v55, %s2129_s27 }
 0x12d   : > { %624 = vrot.lane.b32.xlu1 %v2112_v57, %s3105_s25  ;;  %776 = vrot.lane.b32.xlu0 %v2324_v58, %s2136_s16  ;;  %v2490_v57 = vpop.permute.xlu0 %1743 }
 0x131   : > { %851 = vrot.lane.b32.xlu1 %v2335_v61, %s2137_s17  ;;  %1143 = vrot.lane.b32.xlu0 %v2339_v62, %s2138_s18  ;;  %v2504_v49 = vpop.permute.xlu0 %1755  ;;  %v1181_v62 = vcombine.high %v2393_v14, %v2393_v14 }
 0x135   : > { %931 = vrot.lane.b32.xlu1 %v2351_v1, %s2139_s19  ;;  %1234 = vrot.lane.b32.xlu0 %v2355_v2, %s2125_s23 }
 0x139   : > { %644 = vrot.lane.b32.xlu1 %v2265_v38, %s3099_s26  ;;  %1311 = vrot.lane.b32.xlu0 %v2365_v6, %s2140_s20  ;;  %v2462_v38 = vrot.slane %v2452_v36, %v2228_v9 }
 0x13d   : > { %1104 = vrot.lane.b32.xlu1 %v2377_v10, %s2141_s21  ;;  %1412 = vrot.lane.b32.xlu0 %v2381_v11, %s3099_s26  ;;  %s2143_s26 = smov 126  }
 0x141   : > { %1182 = vrot.lane.b32.xlu1 %v2393_v14, %s2132_s30  ;;  %1522 = vrot.lane.b32.xlu0 %v2397_v15, %s3103_s22  ;;  %s3109_s22 = smov 96  }
 0x145   : > { %1272 = vrot.lane.b32.xlu1 %v2409_v18, %s2143_s26  ;;  %1350 = vrot.lane.b32.xlu0 %v2413_v19, %s3101_s24  ;;  %s3107_s24 = smov 110  }
 0x149   : > { %1072 = vrot.lane.b32.xlu1 %v2427_v23, %s2131_s29  ;;  %1386 = vrot.lane.b32.xlu0 %v1380_v28, %s3105_s25  ;;  %s2146_s25 = smov 95   ;;  %v948_v28 = vcombine.high %v2300_v52, %v2300_v52 }
 0x14b   : > { %v962_v51 = vrot.slane %v948_v28, %v2228_v9  ;;  %v775_v28 = vcombine.high %v2324_v58, %v2324_v58 }
 0x14d   : > { %1450 = vrot.lane.b32.xlu1 %v2440_v32, %s3107_s24  ;;  %1564 = vrot.lane.b32.xlu0 %v2444_v33, %s3109_s22  ;;  %s2147_s24 = smov 94   ;;  %s2148_s22 = smov 98  }
 0x151   : > { %1593 = vrot.lane.b32.xlu1 %v2458_v37, %s2146_s25  ;;  %1632 = vrot.lane.b32.xlu0 %v2462_v38, %s2147_s24 }
 0x155   : > { %1489 = vrot.lane.b32.xlu1 %v2476_v42, %s2148_s22  ;;  %811 = vrot.lane.b32.xlu0 %v808_v44, %s2133_s11  ;;  %v2501_v44 = vpop.permute.xlu1 %2052 }
 0x159   : > { %813 = vrot.lane.b32.xlu1 %v807_v46, %s2133_s11  ;;  %882 = vrot.lane.b32.xlu0 %v879_v48, %s2134_s12  ;;  %v987_v46 = vcombine.high %v2304_v53, %v2304_v53  ;;  %v2514_v52 = vpop.permute.xlu1 %2057  ;;  %v760_v48 = vcombine.high %v2318_v56, %v2318_v56  ;;  %v1023_v53 = vld [vmem:[#allocation3] sm:$0x3f] }
 0x15b   : > { %v1001_v54 = vrot.slane %v987_v46, %v2228_v9  ;;  %v774_v55 = vrot.slane %v760_v48, %v2228_v9  ;;  %v1025_v46 = vcombine.low %v1023_v53, %v1023_v53 }
 0x15d   : > { %884 = vrot.lane.b32.xlu1 %v878_v50, %s2134_s12  ;;  %966 = vrot.lane.b32.xlu0 %v963_v43, %s2135_s15  ;;  %v2519_v50 = vpop.permute.xlu0 %1767  ;;  %v915_v43 = vcombine.high %v2341_v63, %v2341_v63  ;;  %v2530_v56 = vpop.permute.xlu1 %1781  ;;  %v2539_v48 = vrot.slane %v1025_v46, %v2228_v9  ;;  %v1088_v63 = vcombine.high %v2367_v7, %v2367_v7  ;;  %v2560_v46 = vld [vmem:[%s3088_s0] sm:$0x3]  ;;  %s3140_s12 = smov 112  }
 0x15e   : > { %3124 = vst [vmem:[#allocation10_spill] sm:$0xff] %v2530_v56  ;;  %vm459_vm4 = vcmp.ge.s32.totalorder %v2560_v46, 1  ;;  %vm510_vm5 = vcmp.lt.s32.totalorder %v2560_v46, 15 }
 0x15f   : > { %v929_v58 = vrot.slane %v915_v43, %v2228_v9  ;;  %v1102_v43 = vrot.slane %v1088_v63, %v2228_v9  ;;  %v1166_v63 = vcombine.high %v2383_v12, %v2383_v12  ;;  %v2579_v12 = vsub.s32 1, %v2216_v4 }
 0x161   : > { %968 = vrot.lane.b32.xlu1 %v962_v51, %s2135_s15  ;;  %1005 = vrot.lane.b32.xlu0 %v1002_v47, %s2129_s27  ;;  %v930_v51 = vcombine.high %v2351_v1, %v2351_v1  ;;  %v2533_v47 = vpop.permute.xlu0 %2062  ;;  %v2546_v1 = vpop.permute.xlu1 %1803 }
 0x162   : > { %3125 = vst [vmem:[#allocation11_spill] sm:$0xff] %v2546_v1 }
 0x165   : > { %1007 = vrot.lane.b32.xlu1 %v1001_v54, %s2129_s27  ;;  %778 = vrot.lane.b32.xlu0 %v775_v28, %s2136_s16  ;;  %v1039_v54 = vrot.slane %v1023_v53, %v2228_v9  ;;  %v1127_v53 = vcombine.high %v2329_v60, %v2329_v60  ;;  %s2008_s27 = sshll.u32 %s3171_s14, 6 }
 0x167   : > { %v1041_v28 = vcombine.low %v1039_v54, %v1039_v54  ;;  %v1141_v54 = vrot.slane %v1127_v53, %v2228_v9  ;;  %v1218_v53 = vcombine.high %v2345_v0, %v2345_v0 }
 0x169   : > { %780 = vrot.lane.b32.xlu1 %v774_v55, %s2136_s16  ;;  %933 = vrot.lane.b32.xlu0 %v930_v51, %s2139_s19  ;;  %v2548_v55 = vpop.permute.xlu0 %2067  ;;  %v847_v51 = vcombine.low %v2335_v61, %v2335_v61  ;;  %v1103_v61 = vcombine.high %v2377_v10, %v2377_v10  ;;  %v1232_v0 = vrot.slane %v1218_v53, %v2228_v9 }
 0x16a   : > { %3126 = vst [vmem:[#allocation12_spill] sm:$0xff] %v2548_v55  ;;  %v1270_v53 = vrot.slane %v1256_v27, %v2228_v9 }
 0x16d   : > { %935 = vrot.lane.b32.xlu1 %v929_v58, %s2139_s19  ;;  %1044 = vrot.lane.b32.xlu0 %v2539_v48, %s2130_s28 }
 0x171   : > { %1046 = vrot.lane.b32.xlu1 %v1041_v28, %s2130_s28  ;;  %1108 = vrot.lane.b32.xlu0 %v1102_v43, %s2141_s21  ;;  %v1180_v43 = vrot.slane %v1166_v63, %v2228_v9 }
 0x173   : > { %v550_v7 = vpop.permute.xlu1 %549  ;;  %v475_v58 = vpop.permute.xlu0 %474 }
 0x175   : > { %849 = vrot.lane.b32.xlu1 %v847_v51, %s2137_s17  ;;  %1147 = vrot.lane.b32.xlu0 %v1141_v54, %s2138_s18  ;;  %v3127_v51 = vmov 0  }
 0x176   : > { %v460_v54 = vsel %vm459_vm4, 1, %v3127_v51  ;;  %v511_v14 = vsel %vm510_vm5, 1, %v3127_v51  ;;  %vm680_vm4 = vcmask 293888   ;;  %vm747_vm5 = vcmp.ge.s32.totalorder %v2560_v46, 2 }
 0x177   : > { %v546_v60 = vpop.permute.xlu1 %545  ;;  %v2570_v28 = vpop.permute.xlu0 %603  ;;  %v464_v4 = vrot.slane %v460_v54, %v2576_v3  ;;  %v468_v24 = vrot.slane %v460_v54, %v2579_v12  ;;  %v519_v56 = vrot.slane %v511_v14, %v2579_v12 }
 0x179   : > { %1106 = vrot.lane.b32.xlu1 %v1103_v61, %s2141_s21  ;;  %1186 = vrot.lane.b32.xlu0 %v1180_v43, %s2132_s30  ;;  %vm2601_vm7 = vcmp.eq.s32.totalorder %v464_v4, 1  ;;  %vm2605_vm8 = vcmp.eq.s32.totalorder %v468_v24, 1  ;;  %vm2640_vm12 = vcmp.eq.s32.totalorder %v519_v56, 1 }
 0x17b   : > { %v479_v10 = vpop.permute.xlu1 %478  ;;  %v2586_v63 = vpop.permute.xlu0 %642 }
 0x17d   : > { %1145 = vrot.lane.b32.xlu1 %v1142_v29, %s2138_s18  ;;  %1238 = vrot.lane.b32.xlu0 %v1232_v0, %s2125_s23 }
 0x17f   : > { %v530_v61 = vpop.permute.xlu1 %529  ;;  %v548_v43 = vpop.permute.xlu0 %547 }
 0x180   : > { %v552_v54 = vsel %vm551_vm6, %v546_v60, %v548_v43  ;;  %v553_v0 = vsel %vm551_vm6, %v548_v43, %v550_v7  ;;  %v1233_v60 = vcombine.high %v2355_v2, %v2355_v2  ;;  %v1056_v43 = vcombine.high %v2415_v20, %v2415_v20 }
 0x181   : > { %1184 = vrot.lane.b32.xlu1 %v1181_v62, %s2132_s30  ;;  %v556_v27 = vsel %vm2601_vm7, %v552_v54, 0.0  ;;  %v557_v5 = vsel %vm2605_vm8, %v553_v0, 0.0  ;;  %1276 = vrot.lane.b32.xlu0 %v1270_v53, %s2143_s26  ;;  %v1309_v62 = vrot.slane %v1295_v16, %v2228_v9  ;;  %v515_v54 = vrot.slane %v511_v14, %v2576_v3  ;;  %s3139_s30 = smov 113  }
 0x182   : > { %v560_v24 = vrot.slane %v556_v27, 4  ;;  %v561_v4 = vrot.slane %v557_v5, 4  ;;  %v1271_v14 = vcombine.high %v2409_v18, %v2409_v18 }
 0x183   : > { %v498_v55 = vpop.permute.xlu1 %497  ;;  %v477_v7 = vpop.permute.xlu0 %476  ;;  %vm2636_vm11 = vcmp.eq.s32.totalorder %v515_v54, 1 }
 0x184   : > { %564 = vst [vmem:[#allocation5 + $0x10] sm:$0xf0] %v560_v24  ;;  %565 = vst [vmem:[#allocation5 + $0x18] sm:$0xf0] %v561_v4  ;;  %v481_v53 = vsel %vm3118_vm9, %v475_v58, %v477_v7  ;;  %v482_v0 = vsel %vm3118_vm9, %v477_v7, %v479_v10  ;;  %v1070_v10 = vrot.slane %v1056_v43, %v2228_v9 }
 0x185   : > { %1236 = vrot.lane.b32.xlu1 %v1233_v60, %s2125_s23  ;;  %v485_v2 = vsel %vm2601_vm7, %v481_v53, 0.0  ;;  %v486_v16 = vsel %vm2605_vm8, %v482_v0, 0.0  ;;  %1315 = vrot.lane.b32.xlu0 %v1309_v62, %s2140_s20  ;;  %v1310_v7 = vcombine.high %v2365_v6, %v2365_v6  ;;  %s3136_s23 = smov 111   ;;  %v1071_v53 = vcombine.high %v2427_v23, %v2427_v23 }
 0x186   : > { %487 = vst [vmem:[#allocation5] sm:$0xf] %v485_v2  ;;  %488 = vst [vmem:[#allocation5 + $0x8] sm:$0xf] %v486_v16  ;;  %v1396_v6 = vcombine.high %v2371_v8, %v2371_v8  ;;  %v1449_v2 = vcombine.high %v2440_v32, %v2440_v32 }
 0x187   : > { %v526_v20 = vpop.permute.xlu1 %525  ;;  %v528_v58 = vpop.permute.xlu0 %527 }
 0x188   : > { %v532_v24 = vsel %vm531_vm10, %v526_v20, %v528_v58  ;;  %v533_v4 = vsel %vm531_vm10, %v528_v58, %v530_v61  ;;  %v1411_v61 = vcombine.high %v2381_v11, %v2381_v11  ;;  %v1410_v8 = vrot.slane %v1396_v6, %v2228_v9 }
 0x189   : > { %1274 = vrot.lane.b32.xlu1 %v1271_v14, %s2143_s26  ;;  %v536_v18 = vsel %vm2636_vm11, %v532_v24, 0.0  ;;  %v537_v60 = vsel %vm2640_vm12, %v533_v4, 0.0  ;;  %1076 = vrot.lane.b32.xlu0 %v1070_v10, %s2131_s29  ;;  %s3137_s26 = smov 110  }
 0x18a   : > { %538 = vst [vmem:[#allocation5 + $0x10] sm:$0xf] %v536_v18  ;;  %539 = vst [vmem:[#allocation5 + $0x18] sm:$0xf] %v537_v60 }
 0x18b   : > { %v578_v56 = vpop.permute.xlu1 %577  ;;  %v500_v62 = vpop.permute.xlu0 %499 }
 0x18c   : > { %v503_v43 = vsel %vm3119_vm13, %v498_v55, %v500_v62  ;;  %v1506_v62 = vcombine.high %v2387_v13, %v2387_v13  ;;  %v1577_v13 = vcombine.high %v2448_v35, %v2448_v35  ;;  %v1334_v35 = vcombine.high %v2403_v17, %v2403_v17 }
 0x18d   : > { %1313 = vrot.lane.b32.xlu1 %v1310_v7, %s2140_s20  ;;  %507 = vst [vmem:[#allocation5 + $0x8] sm:$0xf0] %v503_v43  ;;  %1414 = vrot.lane.b32.xlu0 %v1411_v61, %s3136_s23  ;;  %v1592_v43 = vcombine.high %v2458_v37, %v2458_v37  ;;  %v1349_v37 = vcombine.high %v2413_v19, %v2413_v19 }
 0x18e   : > { %v1488_v19 = vcombine.high %v2476_v42, %v2476_v42  ;;  %v1348_v17 = vrot.slane %v1334_v35, %v2228_v9 }
 0x18f   : > { %v2659_v54 = vpop.permute.xlu1 %626  ;;  %v496_v0 = vpop.permute.xlu0 %495 }
 0x190   : > { %v632_v11 = vsel %vm3117_vm14, %v2659_v54, %v2446_v34  ;;  %v502_v16 = vsel %vm3119_vm13, %v496_v0, %v498_v55  ;;  %v1434_v34 = vcombine.high %v2431_v30, %v2431_v30  ;;  %v1521_v55 = vcombine.high %v2397_v15, %v2397_v15 }
 0x191   : > { %636 = vst [vmem:[#allocation5 + $0x38] sm:$0xf0] %v632_v11  ;;  %1074 = vrot.lane.b32.xlu1 %v1071_v53, %s2131_s29  ;;  %506 = vst [vmem:[#allocation5] sm:$0xf0] %v502_v16  ;;  %1452 = vrot.lane.b32.xlu0 %v1449_v2, %s3137_s26  ;;  %s3138_s29 = smov 97   ;;  %v659_v6 = vld [vmem:[#allocation5 + $0x10] sm:$0xff]  ;;  %v1520_v2 = vrot.slane %v1506_v62, %v2228_v9  ;;  %v1040_v62 = vcombine.low %v2539_v48, %v2539_v48 }
 0x193   : > { %v580_v23 = vpop.permute.xlu1 %579  ;;  %v606_v14 = vpop.permute.xlu0 %605 }
 0x194   : > { %v584_v20 = vsel %vm3120_vm0, %v578_v56, %v580_v23  ;;  %v585_v32 = vsel %vm3120_vm0, %v580_v23, %v2423_v22  ;;  %v610_v24 = vsel %vm609_vm15, %v2570_v28, %v606_v14  ;;  %v611_v30 = vsel %vm609_vm15, %v606_v14, %v2468_v40  ;;  %v658_v4 = vld [vmem:[#allocation5 + $0x8] sm:$0xff]  ;;  %v660_v56 = vld [vmem:[#allocation5 + $0x18] sm:$0xff] }
 0x195   : > { %v588_v58 = vsel %vm2636_vm11, %v584_v20, 0.0  ;;  %v589_v10 = vsel %vm2640_vm12, %v585_v32, 0.0  ;;  %1416 = vrot.lane.b32.xlu1 %v1410_v8, %s3136_s23  ;;  %v614_v15 = vsel %vm2601_vm7, %v610_v24, 0.0  ;;  %v615_v60 = vsel %vm2605_vm8, %v611_v30, 0.0  ;;  %1524 = vrot.lane.b32.xlu0 %v1521_v55, %s3138_s29 }
 0x196   : > { %v592_v22 = vrot.slane %v588_v58, 4  ;;  %v593_v18 = vrot.slane %v589_v10, 4  ;;  %616 = vst [vmem:[#allocation5 + $0x30] sm:$0xf] %v614_v15  ;;  %617 = vst [vmem:[#allocation5 + $0x38] sm:$0xf] %v615_v60  ;;  %v668_v7 = vpack.c.bf16 %v660_v56, %v658_v4  ;;  %v1448_v40 = vrot.slane %v1434_v34, %v2228_v9 }
 0x197   : > { %v2695_v28 = vpop.permute.xlu1 %809  ;;  %v2700_v61 = vpop.permute.xlu0 %880  ;;  %v832_v23 = vcombine.high %v2326_v59, %v2326_v59  ;;  %v1591_v34 = vrot.slane %v1577_v13, %v2228_v9  ;;  %v1366_v14 = vcombine.low %v2419_v21, %v2419_v21  ;;  %v1473_v21 = vcombine.high %v2464_v39, %v2464_v39 }
 0x198   : > { %596 = vst [vmem:[#allocation5 + $0x20] sm:$0xf0] %v592_v22  ;;  %597 = vst [vmem:[#allocation5 + $0x28] sm:$0xf0] %v593_v18  ;;  %690 = vmatprep.subr.bf16.mxu1 %v668_v7  ;;  %v657_v53 = vld [vmem:[#allocation5] sm:$0xff]  ;;  %v1560_v56 = vcombine.low %v2444_v33, %v2444_v33 }
 0x199   : > { %1454 = vrot.lane.b32.xlu1 %v1448_v40, %s3137_s26  ;;  %1595 = vrot.lane.b32.xlu0 %v1592_v43, %s2146_s25  ;;  %v667_v11 = vpack.c.bf16 %v659_v6, %v657_v53  ;;  %v846_v24 = vrot.slane %v832_v23, %v2228_v9  ;;  %v1487_v4 = vrot.slane %v1473_v21, %v2228_v9  ;;  %v365_v21 = vld [vmem:[%s3091_s3] sm:$0xff] }
 0x19a   : > { %v1616_v40 = vcombine.high %v2452_v36, %v2452_v36  ;;  %v1631_v36 = vcombine.high %v2462_v38, %v2462_v38 }
 0x19b   : > { %v2706_v0 = vpop.permute.xlu1 %964  ;;  %691 = vmatpush1.bf16.msra.mxu1 %v667_v11  ;;  %v2711_v16 = vpop.permute.xlu0 %1003  ;;  %v848_v18 = vcombine.low %v846_v24, %v846_v24  ;;  %v1670_v24 = vld [vmem:[%s3095_s7] sm:$0xf] }
 0x19d   : > { %1526 = vrot.lane.b32.xlu1 %v1520_v2, %s3138_s29  ;;  %1352 = vrot.lane.b32.xlu0 %v1349_v37, %s3139_s30  ;;  %v664_v32 = vld [vmem:[#allocation5 + $0x38] sm:$0xff]  ;;  %v1545_v2 = vcombine.high %v2435_v31, %v2435_v31 }
 0x19f   : > { %v625_v8 = vpop.permute.xlu1 %624  ;;  %v662_v20 = vld [vmem:[#allocation5 + $0x28] sm:$0xff]  ;;  %v2728_v58 = vpop.permute.xlu0 %776  ;;  %v661_v15 = vld [vmem:[#allocation5 + $0x20] sm:$0xff]  ;;  %v1559_v35 = vrot.slane %v1545_v2, %v2228_v9 }
 0x1a0   : > { %v631_v55 = vsel %vm3117_vm14, %v625_v8, %v2659_v54  ;;  %v670_v59 = vpack.c.bf16 %v664_v32, %v662_v20  ;;  %v1373_v54 = vrot.slane %v1366_v14, %v2228_v9 }
 0x1a1   : > { %635 = vst [vmem:[#allocation5 + $0x30] sm:$0xf0] %v631_v55  ;;  %1597 = vrot.lane.b32.xlu1 %v1591_v34, %s2146_s25  ;;  %1491 = vrot.lane.b32.xlu0 %v1488_v19, %s2148_s22  ;;  %s3141_s25 = smov 96   ;;  %v1561_v55 = vcombine.low %v1559_v35, %v1559_v35 }
 0x1a2   : > { %692 = vmatprep.subr.bf16.mxu1 %v670_v59  ;;  %v1381_v32 = vcombine.high %v1373_v54, %v1373_v54 }
 0x1a3   : > { %v2732_v10 = vpop.permute.xlu1 %851  ;;  %v2737_v42 = vpop.permute.xlu0 %1143 }
 0x1a5   : > { %1354 = vrot.lane.b32.xlu1 %v1348_v17, %s3139_s30  ;;  %1382 = vrot.lane.b32.xlu0 %v1373_v54, %s3140_s12 }
 0x1a7   : > { %v2743_v30 = vpop.permute.xlu1 %931  ;;  %v2746_v22 = vpop.permute.xlu0 %1234 }
 0x1a8   : > { %v663_v60 = vld [vmem:[#allocation5 + $0x30] sm:$0xff] }
 0x1a9   : > { %1493 = vrot.lane.b32.xlu1 %v1487_v4, %s2148_s22  ;;  %v669_v39 = vpack.c.bf16 %v663_v60, %v661_v15  ;;  %853 = vrot.lane.b32.xlu0 %v848_v18, %s2137_s17  ;;  %v1856_v18 = vld [vmem:[%s3097_s9] sm:$0xff] }
 0x1ab   : > { %v645_v7 = vpop.permute.xlu1 %644  ;;  %693 = vmatpush1.bf16.msra.mxu1 %v669_v39  ;;  %v2760_v6 = vpop.permute.xlu0 %1311  ;;  %v748_v39 = vsel %vm747_vm5, 1, %v3127_v51  ;;  %vm970_vm5 = vcmask 146432  }
 0x1ac   : > { %v649_v43 = vsel %vm648_vm3, %v2586_v63, %v645_v7  ;;  %v650_v53 = vsel %vm648_vm3, %v645_v7, %v2472_v41  ;;  %v1630_v63 = vrot.slane %v1616_v40, %v2228_v9  ;;  %v673_v9 = vld [vmem:[%s3092_s4] sm:$0xf]  ;;  %v756_v2 = vrot.slane %v748_v39, %v2579_v12 }
 0x1ad   : > { %v653_v11 = vsel %vm2636_vm11, %v649_v43, 0.0  ;;  %v654_v33 = vsel %vm2640_vm12, %v650_v53, 0.0  ;;  %1562 = vrot.lane.b32.xlu1 %v1560_v56, %s3141_s25  ;;  %1042 = vrot.lane.b32.xlu0 %v1040_v62, %s2130_s28  ;;  %v752_v43 = vrot.slane %v748_v39, %v2576_v3 }
 0x1ae   : > { %655 = vst [vmem:[#allocation5 + $0x40] sm:$0xf] %v653_v11  ;;  %656 = vst [vmem:[#allocation5 + $0x48] sm:$0xf] %v654_v33  ;;  %vm2859_vm14 = vcmp.eq.s32.totalorder %v756_v2, 1 }
 0x1af   : > { %v2770_v48 = vpop.permute.xlu1 %1104  ;;  %v2772_v41 = vpop.permute.xlu0 %1412 }
 0x1b1   : > { %1634 = vrot.lane.b32.xlu1 %v1631_v36, %s2147_s24  ;;  %1636 = vrot.lane.b32.xlu0 %v1630_v63, %s2147_s24 }
 0x1b3   : > { %v2779_v13 = vpop.permute.xlu1 %1182  ;;  %v2781_v37 = vpop.permute.xlu0 %1522 }
 0x1b5   : > { %2072 = vrot.lane.b32.xlu1 %v2253_v25, %s3139_s30  ;;  %v666_v38 = vld [vmem:[#allocation5 + $0x48] sm:$0xf]  ;;  %v665_v23 = vld [vmem:[#allocation5 + $0x40] sm:$0xf]  ;;  %1817 = vrot.lane.b32.xlu0 %v2257_v26, %s3139_s30 }
 0x1b6   : > { %v672_v8 = vpack.c.bf16 %v666_v38, %v666_v38  ;;  %v671_v34 = vpack.c.bf16 %v665_v23, %v665_v23 }
 0x1b7   : > { %v2787_v20 = vpop.permute.xlu1 %1272  ;;  %v2790_v31 = vpop.permute.xlu0 %1350 }
 0x1b8   : > { %1997 = vmatprep.subr.msk.bf16.mxu1 %vm3116_vm1, %v672_v8  ;;  %v685_v14 = vsel %vm3116_vm1, %v671_v34, 0  ;;  %vm2847_vm1 = vcmp.eq.s32.totalorder %v752_v43, 1 }
 0x1b9   : > { %1384 = vrot.lane.b32.xlu1 %v1381_v32, %s3140_s12  ;;  %695 = vmatpush1.bf16.msra.mxu1 %v685_v14 }
 0x1ba   : > { %1831 = vrot.lane.b32.xlu0 %v2257_v26, %s3140_s12 }
 0x1bb   : > { %v2797_v19 = vpop.permute.xlu1 %1072  ;;  %v2799_v59 = vpop.permute.xlu0 %1386 }
 0x1bc   : > { %1998 = vmatmul.mubr.msk.bf16.vlgmr.msra.gmra.mrb[0].mxu1 %vm680_vm4, %v673_v9  ;;  %vm815_vm4 = vcmask 269312  }
 0x1bd   : > { %1566 = vrot.lane.b32.xlu1 %v1561_v55, %s3141_s25  ;;  %1903 = vmatprep.mubr.bf16.mxu1 %v3127_v51 }
 0x1be   : > { %1843 = vrot.lane.b32.xlu0 %v2257_v26, %s3136_s23 }
 0x1bf   : > { %v2807_v17 = vpop.permute.xlu1 %1450  ;;  %v2812_v54 = vpop.permute.xlu0 %1564 }
 0x1c1   : > { %2077 = vrot.lane.b32.xlu1 %v2253_v25, %s3140_s12  ;;  %s3074_s12 = scalar_lea.vmem %s3098_s10, %s2008_s27 }
 0x1c2   : > { %369 = vperm.xlu0 %2045, %v365_v21  }
 0x1c3   : > { %v2817_v26 = vpop.permute.xlu1 %1593  ;;  %v2822_v4 = vpop.permute.xlu0 %1632 }
 0x1c5   : > { %2082 = vrot.lane.b32.xlu1 %v2253_v25, %s3136_s23  ;;  %v674_v25 = vld [vmem:[%s3093_s5] sm:$0xff] }
 0x1c6   : > { %1673 = vperm.xlu0 %2045, %v1670_v24  }
 0x1c7   : > { %v2830_v15 = vpop.permute.xlu1 %1489  ;;  %v812_v60 = vpop.permute.xlu0 %811 }
 0x1c8   : > { %v816_v56 = vsel %vm815_vm4, %v2695_v28, %v812_v60 }
 0x1c9   : > { %1859 = vperm.xlu1 %2086, %v1856_v18   ;;  %v820_v7 = vsel %vm2601_vm7, %v816_v56, 0.0 }
 0x1ca   : > { %v824_v40 = vrot.slane %v820_v7, 6 }
 0x1cb   : > { %v814_v62 = vpop.permute.xlu1 %813  ;;  %v883_v11 = vpop.permute.xlu0 %882 }
 0x1cc   : > { %v817_v53 = vsel %vm815_vm4, %v812_v60, %v814_v62  ;;  %828 = vst [vmem:[#allocation6] sm:$0xc] %v824_v40  ;;  %v887_v28 = vsel %vm886_vm2, %v2700_v61, %v883_v11  ;;  %vm902_vm4 = vcmp.lt.s32.totalorder %v2560_v46, 14 }
 0x1cd   : > { %v821_v33 = vsel %vm2605_vm8, %v817_v53, 0.0  ;;  %677 = vperm.xlu1 %2086, %v674_v25   ;;  %v891_v63 = vsel %vm2636_vm11, %v887_v28, 0.0  ;;  %v903_v39 = vsel %vm902_vm4, 1, %v3127_v51 }
 0x1ce   : > { %v825_v36 = vrot.slane %v821_v33, 6  ;;  %v895_v38 = vrot.slane %v891_v63, 2  ;;  %v907_v62 = vrot.slane %v903_v39, %v2576_v3  ;;  %v911_v28 = vrot.slane %v903_v39, %v2579_v12 }
 0x1cf   : > { %v885_v23 = vpop.permute.xlu1 %884  ;;  %v967_v32 = vpop.permute.xlu0 %966 }
 0x1d0   : > { %829 = vst [vmem:[#allocation6 + $0x8] sm:$0xc] %v825_v36  ;;  %v888_v34 = vsel %vm886_vm2, %v883_v11, %v885_v23  ;;  %899 = vst [vmem:[#allocation6] sm:$0xc0] %v895_v38  ;;  %v971_v35 = vsel %vm970_vm5, %v2706_v0, %v967_v32  ;;  %vm782_vm2 = vcmask 277504   ;;  %vm2880_vm4 = vcmp.eq.s32.totalorder %v907_v62, 1 }
 0x1d1   : > { %v892_v61 = vsel %vm2640_vm12, %v888_v34, 0.0  ;;  %v975_v55 = vsel %vm2847_vm1, %v971_v35, 0.0 }
 0x1d2   : > { %v896_v14 = vrot.slane %v892_v61, 2  ;;  %v979_v21 = vrot.slane %v975_v55, 6 }
 0x1d3   : > { %v969_v24 = vpop.permute.xlu1 %968  ;;  %v1006_v60 = vpop.permute.xlu0 %1005 }
 0x1d4   : > { %900 = vst [vmem:[#allocation6 + $0x8] sm:$0xc0] %v896_v14  ;;  %v972_v18 = vsel %vm970_vm5, %v967_v32, %v969_v24  ;;  %983 = vst [vmem:[#allocation6 + $0x10] sm:$0xc] %v979_v21  ;;  %v1009_v0 = vsel %vm3118_vm9, %v2711_v16, %v1006_v60  ;;  %vm937_vm5 = vcmask 244736  }
 0x1d5   : > { %v976_v46 = vsel %vm2859_vm14, %v972_v18, 0.0  ;;  %v1013_v7 = vsel %vm2601_vm7, %v1009_v0, 0.0 }
 0x1d6   : > { %v980_v56 = vrot.slane %v976_v46, 6  ;;  %v1017_v25 = vrot.slane %v1013_v7, 4 }
 0x1d7   : > { %v1008_v40 = vpop.permute.xlu1 %1007  ;;  %v779_v51 = vpop.permute.xlu0 %778 }
 0x1d8   : > { %984 = vst [vmem:[#allocation6 + $0x18] sm:$0xc] %v980_v56  ;;  %v1010_v43 = vsel %vm3118_vm9, %v1006_v60, %v1008_v40  ;;  %1021 = vst [vmem:[#allocation6 + $0x10] sm:$0x30] %v1017_v25  ;;  %v783_v16 = vsel %vm782_vm2, %v2728_v58, %v779_v51  ;;  %vm2890_vm9 = vcmp.eq.s32.totalorder %v911_v28, 1 }
 0x1d9   : > { %v1014_v53 = vsel %vm2605_vm8, %v1010_v43, 0.0  ;;  %v787_v33 = vsel %vm2847_vm1, %v783_v16, 0.0 }
 0x1da   : > { %v1018_v11 = vrot.slane %v1014_v53, 4  ;;  %789 = vst [vmem:[#allocation6] sm:$0x3] %v787_v33 }
 0x1db   : > { %v781_v3 = vpop.permute.xlu1 %780  ;;  %v934_v2 = vpop.permute.xlu0 %933 }
 0x1dc   : > { %1022 = vst [vmem:[#allocation6 + $0x18] sm:$0x30] %v1018_v11  ;;  %v784_v63 = vsel %vm782_vm2, %v779_v51, %v781_v3  ;;  %v938_v38 = vsel %vm937_vm5, %v2743_v30, %v934_v2  ;;  %vm855_vm2 = vcmask 261120  }
 0x1dd   : > { %v788_v58 = vsel %vm2859_vm14, %v784_v63, 0.0  ;;  %v942_v23 = vsel %vm2880_vm4, %v938_v38, 0.0 }
 0x1de   : > { %790 = vst [vmem:[#allocation6 + $0x8] sm:$0x3] %v788_v58  ;;  %944 = vst [vmem:[#allocation6 + $0x10] sm:$0x3] %v942_v23 }
 0x1df   : > { %v936_v34 = vpop.permute.xlu1 %935  ;;  %v2894_v61 = vpop.permute.xlu0 %1044 }
 0x1e0   : > { %v939_v32 = vsel %vm937_vm5, %v934_v2, %v936_v34  ;;  %vm1110_vm5 = vcmask 113664  }
 0x1e1   : > { %v943_v35 = vsel %vm2890_vm9, %v939_v32, 0.0 }
 0x1e2   : > { %945 = vst [vmem:[#allocation6 + $0x18] sm:$0x3] %v943_v35 }
 0x1e3   : > { %v1047_v14 = vpop.permute.xlu1 %1046  ;;  %v1109_v55 = vpop.permute.xlu0 %1108 }
 0x1e4   : > { %v1049_v30 = vsel %vm3119_vm13, %v2894_v61, %v1047_v14  ;;  %vm1149_vm13 = vcmask 15360  }
 0x1e5   : > { %1053 = vst [vmem:[#allocation6 + $0x18] sm:$0xc0] %v1049_v30 }
 0x1e7   : > { %v850_v21 = vpop.permute.xlu1 %849  ;;  %v1148_v18 = vpop.permute.xlu0 %1147 }
 0x1e8   : > { %v856_v24 = vsel %vm855_vm2, %v850_v21, %v2732_v10 }
 0x1e9   : > { %860 = vst [vmem:[#allocation6] sm:$0x30] %v856_v24 }
 0x1eb   : > { %v1107_v60 = vpop.permute.xlu1 %1106  ;;  %v1187_v0 = vpop.permute.xlu0 %1186 }
 0x1ec   : > { %v1111_v39 = vsel %vm1110_vm5, %v2770_v48, %v1107_v60  ;;  %v1112_v46 = vsel %vm1110_vm5, %v1107_v60, %v1109_v55  ;;  %vm1317_vm5 = vcmask 932864  }
 0x1ed   : > { %v1115_v56 = vsel %vm2880_vm4, %v1111_v39, 0.0  ;;  %v1116_v7 = vsel %vm2890_vm9, %v1112_v46, 0.0 }
 0x1ee   : > { %v1119_v25 = vrot.slane %v1115_v56, 6  ;;  %v1120_v40 = vrot.slane %v1116_v7, 6 }
 0x1ef   : > { %v1146_v62 = vpop.permute.xlu1 %1145  ;;  %v1239_v53 = vpop.permute.xlu0 %1238 }
 0x1f0   : > { %1123 = vst [vmem:[#allocation6 + $0x20] sm:$0xc] %v1119_v25  ;;  %1124 = vst [vmem:[#allocation6 + $0x28] sm:$0xc] %v1120_v40  ;;  %v1150_v43 = vsel %vm1149_vm13, %v2737_v42, %v1146_v62  ;;  %v1151_v51 = vsel %vm1149_vm13, %v1146_v62, %v1148_v18  ;;  %vm1278_vm13 = vcmask 1031168  }
 0x1f1   : > { %v1154_v48 = vsel %vm2847_vm1, %v1150_v43, 0.0  ;;  %v1155_v16 = vsel %vm2859_vm14, %v1151_v51, 0.0 }
 0x1f2   : > { %v1158_v11 = vrot.slane %v1154_v48, 4  ;;  %v1159_v33 = vrot.slane %v1155_v16, 4 }
 0x1f3   : > { %v1185_v28 = vpop.permute.xlu1 %1184  ;;  %v1277_v2 = vpop.permute.xlu0 %1276 }
 0x1f4   : > { %1162 = vst [vmem:[#allocation6 + $0x20] sm:$0x30] %v1158_v11  ;;  %1163 = vst [vmem:[#allocation6 + $0x28] sm:$0x30] %v1159_v33  ;;  %v1188_v3 = vsel %vm551_vm6, %v2779_v13, %v1185_v28  ;;  %v1189_v63 = vsel %vm551_vm6, %v1185_v28, %v1187_v0 }
 0x1f5   : > { %v1192_v42 = vsel %vm2601_vm7, %v1188_v3, 0.0  ;;  %v1193_v58 = vsel %vm2605_vm8, %v1189_v63, 0.0 }
 0x1f6   : > { %v1196_v38 = vrot.slane %v1192_v42, 2  ;;  %v1197_v23 = vrot.slane %v1193_v58, 2 }
 0x1f7   : > { %v1237_v34 = vpop.permute.xlu1 %1236  ;;  %v1316_v13 = vpop.permute.xlu0 %1315 }
 0x1f8   : > { %1200 = vst [vmem:[#allocation6 + $0x20] sm:$0xc0] %v1196_v38  ;;  %1201 = vst [vmem:[#allocation6 + $0x28] sm:$0xc0] %v1197_v23  ;;  %v1240_v32 = vsel %vm3120_vm0, %v2746_v22, %v1237_v34  ;;  %v1241_v35 = vsel %vm3120_vm0, %v1237_v34, %v1239_v53  ;;  %vm1599_vm0 = vcmask 777216  }
 0x1f9   : > { %v1244_v14 = vsel %vm2636_vm11, %v1240_v32, 0.0  ;;  %v1245_v30 = vsel %vm2640_vm12, %v1241_v35, 0.0 }
 0x1fa   : > { %v1248_v55 = vrot.slane %v1244_v14, 6  ;;  %v1249_v21 = vrot.slane %v1245_v30, 6 }
 0x1fb   : > { %v1275_v24 = vpop.permute.xlu1 %1274  ;;  %v1077_v39 = vpop.permute.xlu0 %1076 }
 0x1fc   : > { %1252 = vst [vmem:[#allocation6 + $0x30] sm:$0xc] %v1248_v55  ;;  %1253 = vst [vmem:[#allocation6 + $0x38] sm:$0xc] %v1249_v21  ;;  %v1279_v18 = vsel %vm1278_vm13, %v2787_v20, %v1275_v24  ;;  %v1280_v60 = vsel %vm1278_vm13, %v1275_v24, %v1277_v2  ;;  %vm1456_vm13 = vcmask 900096  }
 0x1fd   : > { %v1283_v22 = vsel %vm2880_vm4, %v1279_v18, 0.0  ;;  %v1284_v46 = vsel %vm2890_vm9, %v1280_v60, 0.0 }
 0x1fe   : > { %v1287_v0 = vrot.slane %v1283_v22, 4  ;;  %v1288_v56 = vrot.slane %v1284_v46, 4 }
 0x1ff   : > { %v1314_v7 = vpop.permute.xlu1 %1313  ;;  %v1415_v62 = vpop.permute.xlu0 %1414 }
 0x200   : > { %1291 = vst [vmem:[#allocation6 + $0x30] sm:$0x30] %v1287_v0  ;;  %1292 = vst [vmem:[#allocation6 + $0x38] sm:$0x30] %v1288_v56  ;;  %v1318_v25 = vsel %vm1317_vm5, %v2760_v6, %v1314_v7  ;;  %v1319_v40 = vsel %vm1317_vm5, %v1314_v7, %v1316_v13  ;;  %v1418_v51 = vsel %vm648_vm3, %v2772_v41, %v1415_v62  ;;  %vm1528_vm5 = vcmask 793600  }
 0x201   : > { %v1322_v20 = vsel %vm2847_vm1, %v1318_v25, 0.0  ;;  %v1323_v43 = vsel %vm2859_vm14, %v1319_v40, 0.0  ;;  %v1422_v16 = vsel %vm2636_vm11, %v1418_v51, 0.0 }
 0x202   : > { %v1326_v53 = vrot.slane %v1322_v20, 2  ;;  %v1327_v48 = vrot.slane %v1323_v43, 2  ;;  %v1426_v11 = vrot.slane %v1422_v16, 4 }
 0x203   : > { %v1075_v33 = vpop.permute.xlu1 %1074  ;;  %v1453_v3 = vpop.permute.xlu0 %1452 }
 0x204   : > { %1330 = vst [vmem:[#allocation6 + $0x30] sm:$0xc0] %v1326_v53  ;;  %1331 = vst [vmem:[#allocation6 + $0x38] sm:$0xc0] %v1327_v48  ;;  %v1078_v6 = vsel %vm531_vm10, %v2797_v19, %v1075_v33  ;;  %v1079_v28 = vsel %vm531_vm10, %v1075_v33, %v1077_v39  ;;  %v1457_v2 = vsel %vm1456_vm13, %v2807_v17, %v1453_v3  ;;  %v2050_v33 = vunpack.i.h.bf16 %v2485_v45 }
 0x205   : > { %1430 = vst [vmem:[#allocation6 + $0x40] sm:$0x30] %v1426_v11  ;;  %v1082_v41 = vsel %vm2636_vm11, %v1078_v6, 0.0  ;;  %v1083_v63 = vsel %vm2640_vm12, %v1079_v28, 0.0  ;;  %v1461_v42 = vsel %vm2880_vm4, %v1457_v2, 0.0  ;;  %v2049_v6 = vunpack.i.l.bf16 %v2485_v45 }
 0x206   : > { %1084 = vst [vmem:[#allocation6 + $0x20] sm:$0x3] %v1082_v41  ;;  %1085 = vst [vmem:[#allocation6 + $0x28] sm:$0x3] %v1083_v63  ;;  %v1465_v19 = vrot.slane %v1461_v42, 2  ;;  %v2055_v63 = vunpack.i.h.bf16 %v2501_v44  ;;  %v2054_v2 = vunpack.i.l.bf16 %v2501_v44  ;;  %v2060_v45 = vunpack.i.h.bf16 %v2514_v52 }
 0x207   : > { %v1417_v58 = vpop.permute.xlu1 %1416  ;;  %v1525_v23 = vpop.permute.xlu0 %1524 }
 0x208   : > { %v1419_v38 = vsel %vm648_vm3, %v1415_v62, %v1417_v58  ;;  %1469 = vst [vmem:[#allocation6 + $0x40] sm:$0xc0] %v1465_v19  ;;  %v1529_v32 = vsel %vm1528_vm5, %v2781_v37, %v1525_v23  ;;  %v2059_v19 = vunpack.i.l.bf16 %v2514_v52 }
 0x209   : > { %v1423_v34 = vsel %vm2640_vm12, %v1419_v38, 0.0  ;;  %v1533_v17 = vsel %vm2601_vm7, %v1529_v32, 0.0  ;;  %v2065_v32 = vunpack.i.h.bf16 %v2533_v47 }
 0x20a   : > { %v1427_v35 = vrot.slane %v1423_v34, 4  ;;  %v1537_v13 = vrot.slane %v1533_v17, 6 }
 0x20b   : > { %v1455_v14 = vpop.permute.xlu1 %1454  ;;  %v1596_v55 = vpop.permute.xlu0 %1595 }
 0x20c   : > { %1431 = vst [vmem:[#allocation6 + $0x48] sm:$0x30] %v1427_v35  ;;  %v1458_v30 = vsel %vm1456_vm13, %v1453_v3, %v1455_v14  ;;  %1541 = vst [vmem:[#allocation6 + $0x50] sm:$0xc] %v1537_v13  ;;  %v1600_v24 = vsel %vm1599_vm0, %v2817_v26, %v1596_v55  ;;  %vm1495_vm13 = vcmask 801792   ;;  %v2064_v35 = vunpack.i.l.bf16 %v2533_v47 }
 0x20d   : > { %v1462_v21 = vsel %vm2890_vm9, %v1458_v30, 0.0  ;;  %v1604_v37 = vsel %vm2636_vm11, %v1600_v24, 0.0  ;;  %v1770_v13 = vsel %vm531_vm10, %v2060_v45, %v2519_v50 }
 0x20e   : > { %v1466_v18 = vrot.slane %v1462_v21, 2  ;;  %v1608_v60 = vrot.slane %v1604_v37, 2  ;;  %v1783_v50 = vsel %vm551_vm6, %v2064_v35, %v2065_v32 }
 0x20f   : > { %v1527_v39 = vpop.permute.xlu1 %1526  ;;  %v1353_v46 = vpop.permute.xlu0 %1352  ;;  %v1787_v12 = vsel %vm2601_vm7, %v1783_v50, -3e+38 }
 0x210   : > { %1470 = vst [vmem:[#allocation6 + $0x48] sm:$0xc0] %v1466_v18  ;;  %v1530_v22 = vsel %vm1528_vm5, %v1525_v23, %v1527_v39  ;;  %1612 = vst [vmem:[#allocation6 + $0x50] sm:$0xc0] %v1608_v60  ;;  %v1356_v56 = vsel %vm609_vm15, %v2790_v31, %v1353_v46  ;;  %v1650_v18 = vld [vmem:[#allocation6 + $0x18] sm:$0xff] }
 0x211   : > { %v1534_v0 = vsel %vm2605_vm8, %v1530_v22, 0.0  ;;  %v1360_v26 = vsel %vm2601_vm7, %v1356_v56, 0.0  ;;  %v3155_v22 = vld [vmem:[#allocation10_spill] sm:$0xff] }
 0x212   : > { %v1538_v7 = vrot.slane %v1534_v0, 6  ;;  %1362 = vst [vmem:[#allocation6 + $0x40] sm:$0x3] %v1360_v26  ;;  %v1652_v0 = vld [vmem:[#allocation6 + $0x28] sm:$0xff] }
 0x213   : > { %v1598_v25 = vpop.permute.xlu1 %1597  ;;  %v1492_v62 = vpop.permute.xlu0 %1491 }
 0x214   : > { %1542 = vst [vmem:[#allocation6 + $0x58] sm:$0xc] %v1538_v7  ;;  %v1601_v40 = vsel %vm1599_vm0, %v1596_v55, %v1598_v25  ;;  %v1496_v43 = vsel %vm1495_vm13, %v2830_v15, %v1492_v62  ;;  %vm3150_vm0 = vcmask 138240   ;;  %v1647_v7 = vld [vmem:[#allocation6] sm:$0xff] }
 0x215   : > { %v1605_v20 = vsel %vm2640_vm12, %v1601_v40, 0.0  ;;  %v1500_v31 = vsel %vm2847_vm1, %v1496_v43, 0.0  ;;  %vm1568_vm1 = vcmask 785408   ;;  %v1745_v42 = vsel %vm3150_vm0, %v2049_v6, %v2050_v33  ;;  %vm3151_vm5 = vmmov %vm3150_vm0 }
 0x216   : > { %v1609_v51 = vrot.slane %v1605_v20, 2  ;;  %1502 = vst [vmem:[#allocation6 + $0x50] sm:$0x3] %v1500_v31  ;;  %v1746_v9 = vsel %vm3151_vm5, %v2050_v33, %v2490_v57  ;;  %v1749_v23 = vsel %vm2601_vm7, %v1745_v42, -3e+38  ;;  %v1769_v57 = vsel %vm531_vm10, %v2059_v19, %v2060_v45  ;;  %v1651_v31 = vld [vmem:[#allocation6 + $0x20] sm:$0xff] }
 0x217   : > { %v1355_v53 = vpop.permute.xlu1 %1354  ;;  %v2980_v16 = vpop.permute.xlu0 %1382  ;;  %v1750_v17 = vsel %vm2605_vm8, %v1746_v9, -3e+38  ;;  %v1773_v47 = vsel %vm2636_vm11, %v1769_v57, -3e+38  ;;  %vm3159_vm10 = vcmask 1039360   ;;  %v3160_v19 = vld [vmem:[#allocation11_spill] sm:$0xff] }
 0x218   : > { %1613 = vst [vmem:[#allocation6 + $0x58] sm:$0xc0] %v1609_v51  ;;  %v1357_v48 = vsel %vm609_vm15, %v1353_v46, %v1355_v53  ;;  %v1784_v46 = vsel %vm551_vm6, %v2065_v32, %v3155_v22  ;;  %v3156_v53 = vld [vmem:[#allocation12_spill] sm:$0xff]  ;;  %vm3157_vm6 = vcmask 916480   ;;  %v2110_v9 = vld [vmem:[#allocation4 + $0x4] sm:$0xff] }
 0x219   : > { %v1361_v11 = vsel %vm2605_vm8, %v1357_v48, 0.0  ;;  %v1788_v20 = vsel %vm2605_vm8, %v1784_v46, -3e+38  ;;  %v2070_v48 = vunpack.i.h.bf16 %v3156_v53 }
 0x21a   : > { %1363 = vst [vmem:[#allocation6 + $0x48] sm:$0x3] %v1361_v11  ;;  %v2069_v11 = vunpack.i.l.bf16 %v3156_v53  ;;  %v1669_v53 = vld [vmem:[%s3094_s6] sm:$0x3] }
 0x21b   : > { %v1494_v15 = vpop.permute.xlu1 %1493  ;;  %v854_v8 = vpop.permute.xlu0 %853 }
 0x21c   : > { %v1497_v28 = vsel %vm1495_vm13, %v1492_v62, %v1494_v15  ;;  %v857_v41 = vsel %vm855_vm2, %v2732_v10, %v854_v8  ;;  %vm1638_vm2 = vcmask 769024   ;;  %v1654_v62 = vld [vmem:[#allocation6 + $0x38] sm:$0xff]  ;;  %v1653_v8 = vld [vmem:[#allocation6 + $0x30] sm:$0xff]  ;;  %v1805_v45 = vsel %vm3159_vm10, %v2069_v11, %v2070_v48 }
 0x21d   : > { %v1501_v3 = vsel %vm2859_vm14, %v1497_v28, 0.0  ;;  %861 = vst [vmem:[#allocation6 + $0x8] sm:$0x30] %v857_v41  ;;  %vm3152_vm14 = vcmask 130048   ;;  %v1664_v51 = vpack.c.bf16 %v1654_v62, %v1652_v0  ;;  %v3167_v11 = vld [vmem:[#allocation8_spill] sm:$0xff] }
 0x21e   : > { %1503 = vst [vmem:[#allocation6 + $0x58] sm:$0x3] %v1501_v3  ;;  %vm3153_vm13 = vmmov %vm3152_vm14 }
 0x21f   : > { %v1563_v58 = vpop.permute.xlu1 %1562  ;;  %v1043_v38 = vpop.permute.xlu0 %1042  ;;  %v1758_v34 = vsel %vm3153_vm13, %v2055_v63, %v2504_v49  ;;  %vm3154_vm0 = vmmov %vm3153_vm13 }
 0x220   : > { %v1569_v10 = vsel %vm1568_vm1, %v1563_v58, %v2812_v54  ;;  %v1048_v44 = vsel %vm3152_vm14, %v1043_v38, %v2894_v61  ;;  %v1757_v52 = vsel %vm3154_vm0, %v2054_v2, %v2055_v63  ;;  %v1762_v37 = vmax.f32 %v1750_v17, %v1758_v34  ;;  %v3162_v38 = vld [vmem:[#allocation7_spill] sm:$0xff] }
 0x221   : > { %1573 = vst [vmem:[#allocation6 + $0x50] sm:$0x30] %v1569_v10  ;;  %1052 = vst [vmem:[#allocation6 + $0x10] sm:$0xc0] %v1048_v44  ;;  %v1761_v49 = vmax.f32 %v1749_v23, %v1757_v52  ;;  %v1663_v2 = vpack.c.bf16 %v1653_v8, %v1651_v31  ;;  %v1809_v52 = vsel %vm2636_vm11, %v1805_v45, -3e+38 }
 0x223   : > { %v1635_v61 = vpop.permute.xlu1 %1634  ;;  %v1637_v30 = vpop.permute.xlu0 %1636  ;;  %v1775_v56 = vmax.f32 %v1761_v49, %v1773_v47 }
 0x224   : > { %v1639_v14 = vsel %vm1638_vm2, %v2822_v4, %v1635_v61  ;;  %v1640_v21 = vsel %vm1638_vm2, %v1635_v61, %v1637_v30  ;;  %v1648_v24 = vld [vmem:[#allocation6 + $0x8] sm:$0xff]  ;;  %v1774_v4 = vsel %vm2640_vm12, %v1770_v13, -3e+38 }
 0x225   : > { %v1643_v55 = vsel %vm2880_vm4, %v1639_v14, 0.0  ;;  %v1644_v60 = vsel %vm2890_vm9, %v1640_v21, 0.0  ;;  %v1662_v39 = vpack.c.bf16 %v1650_v18, %v1648_v24  ;;  %v1776_v25 = vmax.f32 %v1762_v37, %v1774_v4  ;;  %vm3158_vm9 = vmmov %vm3157_vm6 }
 0x226   : > { %1645 = vst [vmem:[#allocation6 + $0x60] sm:$0x3] %v1643_v55  ;;  %1646 = vst [vmem:[#allocation6 + $0x68] sm:$0x3] %v1644_v60  ;;  %v1789_v15 = vmax.f32 %v1775_v56, %v1787_v12 }
 0x227   : > { %v2073_v36 = vpop.permute.xlu1 %2072  ;;  %1687 = vmatprep.subr.bf16.mxu0 %v1662_v39  ;;  %v1818_v28 = vpop.permute.xlu0 %1817  ;;  %v1790_v3 = vmax.f32 %v1776_v25, %v1788_v20  ;;  %vm3161_vm4 = vmmov %vm3159_vm10 }
 0x228   : > { %v1649_v26 = vld [vmem:[#allocation6 + $0x10] sm:$0xff]  ;;  %v2075_v41 = vunpack.i.h.bf16 %v2073_v36  ;;  %v2074_v63 = vunpack.i.l.bf16 %v2073_v36  ;;  %v1795_v10 = vmax.f32 %v1789_v15, %v2110_v9 }
 0x229   : > { %v1661_v40 = vpack.c.bf16 %v1649_v26, %v1647_v7  ;;  %v1796_v44 = vmax.f32 %v1790_v3, %v3162_v38  ;;  %v1657_v18 = vld [vmem:[#allocation6 + $0x50] sm:$0xff] }
 0x22a   : > { %v1819_v23 = vsel %vm609_vm15, %v2074_v63, %v2075_v41  ;;  %v1820_v34 = vsel %vm609_vm15, %v2075_v41, %v1818_v28  ;;  %v1811_v13 = vmax.f32 %v1795_v10, %v1809_v52 }
 0x22b   : > { %v1385_v43 = vpop.permute.xlu1 %1384  ;;  %1688 = vmatpush1.bf16.msra.mxu0 %v1661_v40  ;;  %v1823_v17 = vsel %vm2601_vm7, %v1819_v23, -3e+38  ;;  %v1824_v61 = vsel %vm2605_vm8, %v1820_v34, -3e+38  ;;  %vm1680_vm7 = vcmask 1040384   ;;  %vm3165_vm8 = vcmask 1041408  }
 0x22c   : > { %v1388_v33 = vsel %vm3157_vm6, %v2980_v16, %v1385_v43  ;;  %v1389_v6 = vsel %vm3158_vm9, %v1385_v43, %v2799_v59  ;;  %1689 = vmatprep.subr.bf16.mxu0 %v1664_v51  ;;  %v1806_v16 = vsel %vm3161_vm4, %v2070_v48, %v3160_v19  ;;  %v1832_v58 = vpop.permute.xlu0 %1831  ;;  %v1825_v37 = vmax.f32 %v1811_v13, %v1823_v17  ;;  %v1853_v48 = vld [vmem:[%s3096_s8] sm:$0xf] }
 0x22d   : > { %1392 = vst [vmem:[#allocation6 + $0x40] sm:$0xc] %v1388_v33  ;;  %1393 = vst [vmem:[#allocation6 + $0x48] sm:$0xc] %v1389_v6  ;;  %v1810_v57 = vsel %vm2640_vm12, %v1806_v16, -3e+38 }
 0x22e   : > { %v1812_v14 = vmax.f32 %v1796_v44, %v1810_v57  ;;  %v1659_v47 = vld [vmem:[#allocation6 + $0x60] sm:$0x3]  ;;  %v1660_v36 = vld [vmem:[#allocation6 + $0x68] sm:$0x3] }
 0x22f   : > { %v1567_v42 = vpop.permute.xlu1 %1566  ;;  %1690 = vmatpush1.bf16.msra.mxu0 %v1663_v2  ;;  %v1668_v12 = vpack.c.bf16 %v1660_v36, %v1660_v36  ;;  %v1667_v25 = vpack.c.bf16 %v1659_v47, %v1659_v47  ;;  %v3168_v6 = vld [vmem:[#allocation9_spill] sm:$0xff] }
 0x230   : > { %v1570_v59 = vsel %vm1568_vm1, %v2812_v54, %v1567_v42  ;;  %vm3163_vm1 = vmmov %vm3157_vm6  ;;  %v1844_v24 = vpop.permute.xlu0 %1843  ;;  %v1826_v60 = vmax.f32 %v1812_v14, %v1824_v61 }
 0x231   : > { %1574 = vst [vmem:[#allocation6 + $0x58] sm:$0x30] %v1570_v59  ;;  %vm3164_vm15 = vmmov %vm3163_vm1  ;;  %v1682_v31 = vsel %vm1680_vm7, %v1667_v25, 0 }
 0x233   : > { %v2078_v32 = vpop.permute.xlu1 %2077 }
 0x234   : > { %v2080_v35 = vunpack.i.h.bf16 %v2078_v32  ;;  %v2079_v54 = vunpack.i.l.bf16 %v2078_v32  ;;  %v1655_v30 = vld [vmem:[#allocation6 + $0x40] sm:$0xff]  ;;  %v1656_v1 = vld [vmem:[#allocation6 + $0x48] sm:$0xff] }
 0x235   : > { %v1665_v22 = vpack.c.bf16 %v1657_v18, %v1655_v30 }
 0x236   : > { %v1833_v49 = vsel %vm3163_vm1, %v2079_v54, %v2080_v35  ;;  %v1834_v55 = vsel %vm3164_vm15, %v2080_v35, %v1832_v58 }
 0x237   : > { %v2083_v21 = vpop.permute.xlu1 %2082  ;;  %v1837_v46 = vmax.f32 %v1825_v37, %v1833_v49  ;;  %v1838_v0 = vmax.f32 %v1826_v60, %v1834_v55 }
 0x238   : > { %v2085_v39 = vunpack.i.h.bf16 %v2083_v21  ;;  %v2084_v50 = vunpack.i.l.bf16 %v2083_v21  ;;  %v1658_v4 = vld [vmem:[#allocation6 + $0x58] sm:$0xff] }
 0x239   : > { %v1666_v29 = vpack.c.bf16 %v1658_v4, %v1656_v1 }
 0x23a   : > { %v1845_v56 = vsel %vm648_vm3, %v2084_v50, %v2085_v39  ;;  %v1846_v7 = vsel %vm648_vm3, %v2085_v39, %v1844_v24  ;;  %vm3166_vm3 = vmmov %vm3165_vm8 }
 0x23b   : > { %v1850_v26 = vsel %vm2640_vm12, %v1846_v7, -3e+38  ;;  %1691 = vmatprep.subr.bf16.mxu0 %v1666_v29  ;;  %v1849_v40 = vsel %vm2636_vm11, %v1845_v56, -3e+38  ;;  %vm1676_vm12 = vcmask 408576   ;;  %vm3169_vm11 = vcmask 31744  }
 0x23c   : > { %v1852_v62 = vmax.f32 %v1838_v0, %v1850_v26  ;;  %1692 = vmatpush1.bf16.msra.mxu0 %v1665_v22  ;;  %v1851_v20 = vmax.f32 %v1837_v46, %v1849_v40 }
 0x23d   : > { %2001 = vmatprep.subr.msk.bf16.mxu0 %vm1680_vm7, %v1668_v12 }
 0x23e   : > { %v1855_v43 = vpack.c.bf16 %v1852_v62, %v1852_v62  ;;  %v1854_v51 = vpack.c.bf16 %v1851_v20, %v1851_v20 }
 0x240   : > { %1694 = vmatpush1.bf16.msra.mxu0 %v1682_v31  ;;  %2003 = vmatprep.subr.msk.bf16.mxu1 %vm3165_vm8, %v1855_v43  ;;  %v1866_v5 = vsel %vm3166_vm3, %v1854_v51, 0 }
 0x241   : > { %v370_v27 = vpop.permute.xlu0 %369  ;;  %1872 = vmatpush1.bf16.msra.mxu1 %v1866_v5 }
 0x242   : > { %v437_v33 = vadd.f32 %v3167_v11, %v370_v27  ;;  %v439_v15 = vadd.f32 %v3168_v6, %v370_v27 }
 0x243   : > { %2002 = vmatmul.mubr.msk.bf16.vlgmr.msra.gmra.mrb[4].mxu0 %vm1676_vm12, %v1669_v53 }
 0x244   : > { %v445_v28 = vmax.f32 %v437_v33, 0.0  ;;  %v446_v8 = vmax.f32 %v439_v15, 0.0  ;;  %2004 = vmatmul.mubr.msk.bf16.vlgmr.msra.gmra.mrb[4].mxu1 %vm3169_vm11, %v1853_v48 }
 0x245   : > { %v1674_v9 = vpop.permute.xlu0 %1673 }
 0x246   : > { %1914 = vst [vmem:[%s3074_s12] sm:$0xff] %v445_v28  ;;  %1915 = vst [vmem:[%s3074_s12 + $0x8] sm:$0xff] %v446_v8 }
 0x248   : > { %v1860_v3 = vpop.permute.xlu1 %1859 }
 0x24c   : > { %v678_v41 = vpop.permute.xlu1 %677 }
 0x28f   : > { %v724_v63 = vpop.f32.mrb[0].mxu1 }
 0x290   : > { %v726_v2 = vpop.f32.mrb[1].mxu1  ;;  %v725_v42 = vadd.f32 %v724_v63, %v678_v41 }
 0x291   : > { %v728_v45 = vpop.f32.mrb[2].mxu1  ;;  %v727_v19 = vadd.f32 %v726_v2, %v678_v41 }
 0x292   : > { %v731_v16 = vmax.f32 %v725_v42, 0.0  ;;  %v729_v59 = vpop.f32.mrb[3].mxu1 }
 0x293   : > { %v732_v58 = vmax.f32 %v727_v19, 0.0 }
 0x294   : > { %1916 = vst [vmem:[%s3074_s12 + $0x10] sm:$0xff] %v731_v16 }
 0x295   : > { %1917 = vst [vmem:[%s3074_s12 + $0x18] sm:$0xff] %v732_v58 }
 0x316   : > { %v1721_v10 = vpop.f32.mrb[4].mxu0 }
 0x317   : > { %v1722_v38 = vadd.f32 %v1721_v10, %v1674_v9  ;;  %v1723_v44 = vpop.f32.mrb[5].mxu0  ;;  %v1905_v23 = vpop.f32.mrb[4].mxu1 }
 0x318   : > { %v1724_v34 = vadd.f32 %v1723_v44, %v1674_v9  ;;  %v1906_v52 = vadd.f32 %v1905_v23, %v1860_v3  ;;  %v1907_v57 = vpop.f32.mrb[5].mxu1  ;;  %v1725_v32 = vpop.f32.mrb[6].mxu0 }
 0x319   : > { %v1728_v35 = vmax.f32 %v1722_v38, 0.0  ;;  %v1908_v54 = vadd.f32 %v1907_v57, %v1860_v3  ;;  %v1909_v17 = vpop.f32.mrb[6].mxu1  ;;  %v1726_v61 = vpop.f32.mrb[7].mxu0 }
 0x31a   : > { %v1729_v13 = vmax.f32 %v1724_v34, 0.0  ;;  %v1912_v14 = vmax.f32 %v1906_v52, 0.0  ;;  %v1910_v30 = vpop.f32.mrb[7].mxu1 }
 0x31b   : > { %1918 = vst [vmem:[%s3074_s12 + $0x20] sm:$0xf] %v1728_v35  ;;  %v1913_v49 = vmax.f32 %v1908_v54, 0.0 }
 0x31c   : > { %1919 = vst [vmem:[%s3074_s12 + $0x28] sm:$0xf] %v1729_v13  ;;  %v1922_v55 = vrot.slane %v1912_v14, 4 }
 0x31d   : > { %v1923_v21 = vrot.slane %v1913_v49, 4 }
 0x31e   : > { %1926 = vst [vmem:[%s3074_s12 + $0x30] ss:$-12 sps:$4 sm:$0xff] %v1922_v55  }
 0x31f   : > { %1927 = vst [vmem:[%s3074_s12 + $0x38] ss:$-12 sps:$4 sm:$0xff] %v1923_v21  }
 0x320 PF: > { %s20_s13 = sadd.s32 1, %s2119_s13  }
 0x321   : > { %p17_p4 = scmp.ge.s32.totalorder %s20_s13, 4  }
 0x323   :  { %19 = sbr.rel (!%p17_p4) target bundleno = 1 (0x1), region = 90 }

</bundles_post_ra>
